<compile_context>
chip_gen: v7x
topology: tpu7x:2x2x1
jax: 0.10.0
libtpu: 0.0.40
codegen_flags: <defaults>
</compile_context>

<pallas_src>
import functools
import math

import jax
import jax.numpy as jnp
from jax import lax
from jax.experimental import pallas as pl
from jax.experimental.pallas import tpu as pltpu


def _gelu_exact(x):
    # Exact (erf-based) GELU matching torch.nn.functional.gelu default.
    # erf via Abramowitz & Stegun 7.1.26 (|err| < 1.5e-7).  The divide is
    # done on the EUP (approx reciprocal) - kernel-only helper.
    z = x * 0.7071067811865476
    az = jnp.abs(z)
    t = pl.reciprocal(1.0 + 0.3275911 * az, approx=True)
    poly = t * (0.254829592 + t * (-0.284496736 + t * (1.421413741
                + t * (-1.453152027 + t * 1.061405429))))
    erf_abs = 1.0 - poly * jnp.exp(-az * az)
    erf_z = jnp.where(z >= 0.0, erf_abs, -erf_abs)
    return 0.5 * x * (1.0 + erf_z)


# ---------------------------------------------------------------------------
# Fused kernel: QKV proj + per-head channel attention + output proj
#               + (dwconv3x3 -> GELU -> dwconv3x3) positional branch + add.
# One grid step per batch element.  All compute is channels-major (C, n) so
# every vector op is lane-dense over n; the output is transposed on the MXU
# and stored as (n, C) so the wrapper reshape to (B, H, W, C) is free.
# ---------------------------------------------------------------------------
def _ms_msa_kernel(x_ref, wqkv_ref, wp_ref, bp_ref, smask_ref, bmask_ref,
                   w1_ref, w2_ref, cmask_ref, o_ref, padbuf,
                   *, heads, dim_head, H, W, P0):
    hd = heads * dim_head
    n = H * W
    C = padbuf.shape[0]

    # ---- fused QKV projection: one bf16 MXU matmul, channels-major.
    # qkv_t[r, p] = sum_c wqkv[c, r] * x_t[c, p]                 -> (3*hd, n)
    qkv_t = lax.dot_general(wqkv_ref[...], x_ref[0],
                            (((0,), (0,)), ((), ())),
                            preferred_element_type=jnp.float32)
    q_t = qkv_t[0:hd, :]
    k_t = qkv_t[hd:2 * hd, :]
    v_t = qkv_t[2 * hd:3 * hd, :]

    # ---- L2-normalize each (head, d) channel over n (rsqrt -> EUP), in f32.
    q_n = q_t * lax.rsqrt(jnp.maximum(
        jnp.sum(q_t * q_t, axis=1, keepdims=True), 1e-24))
    k_n = k_t * lax.rsqrt(jnp.maximum(
        jnp.sum(k_t * k_t, axis=1, keepdims=True), 1e-24))

    # ---- all heads at once: (hd, hd) Gram matrix (bf16 operands, f32 acc),
    # block-diagonal rescale (smask) + off-block -1e30 (bmask) before softmax.
    attn = lax.dot_general(k_n.astype(jnp.bfloat16), q_n.astype(jnp.bfloat16),
                           (((1,), (1,)), ((), ())),
                           preferred_element_type=jnp.float32)
    attn = attn * smask_ref[...] + bmask_ref[...]
    # No max-subtraction: logits are bounded by |rescale| (unit-norm q/k) and
    # the -1e30 masked entries still exp to exactly 0.
    attn = jnp.exp(attn)
    attn = attn * pl.reciprocal(jnp.sum(attn, axis=-1, keepdims=True),
                                approx=True)

    # ---- attention apply + output projection (bf16 MXU operands, f32 acc).
    v_bf = v_t.astype(jnp.bfloat16)
    out_t = lax.dot_general(attn.astype(jnp.bfloat16), v_bf,
                            (((1,), (0,)), ((), ())),
                            preferred_element_type=jnp.float32)     # (hd, n)
    proj_t = lax.dot_general(wp_ref[...], out_t.astype(jnp.bfloat16),
                             (((0,), (0,)), ((), ())),
                             preferred_element_type=jnp.float32)    # (C, n)
    proj_t = proj_t + bp_ref[...]

    # ---- positional branch, fully in VMEM, channels-major.
    # A 3x3 tap is a static lane offset s = di*W + dj into a zero-halo scratch
    # row.  Row validity is free (halo reads are genuine zeros); only the
    # column wrap (dj = +/-1) needs a mask, applied once per dj group.
    padbuf[:, 0:P0] = jnp.zeros((C, P0), jnp.float32)
    padbuf[:, P0 + n:2 * P0 + n] = jnp.zeros((C, P0), jnp.float32)
    cmask = cmask_ref[...]                                           # (2, n)

    def dwconv(src, w):                        # src (C, n) f32, w (C, 9) f32
        padbuf[:, P0:P0 + n] = src
        acc = None
        for tj, dj in enumerate((-1, 0, 1)):
            inner = None
            for ti, di in enumerate((-1, 0, 1)):
                t = ti * 3 + tj                # weight tap (di+1)*3 + (dj+1)
                s = di * W + dj                # static lane offset
                term = padbuf[:, P0 + s:P0 + s + n] * w[:, t:t + 1]
                inner = term if inner is None else inner + term
            if dj != 0:                        # column-wrap mask, dj = +/-1
                row = 0 if dj < 0 else 1
                inner = inner * cmask[row:row + 1, :]
            acc = inner if acc is None else acc + inner
        return acc

    y = dwconv(v_t, w1_ref[...])
    y = _gelu_exact(y)
    pos_t = dwconv(y, w2_ref[...])

    # ---- fused add, then transpose (C, n) -> (n, C) on the MXU via a CxC
    # identity so the store is already in output layout (wrapper reshape is
    # free; no extra XLA transpose / HBM round trip).
    y_cn = proj_t + pos_t                                            # (C, n)
    eye = (lax.broadcasted_iota(jnp.int32, (C, C), 0)
           == lax.broadcasted_iota(jnp.int32, (C, C), 1)).astype(jnp.float32)
    o_nc = lax.dot_general(y_cn, eye, (((0,), (0,)), ((), ())),
                           preferred_element_type=jnp.float32)       # (n, C)
    o_ref[0] = o_nc.astype(o_ref.dtype)


# ---------------------------------------------------------------------------
# Full MS_MSA forward.
# ---------------------------------------------------------------------------
def ms_msa_forward(x_in, params):
    wq, wk, wv = params["wq"], params["wk"], params["wv"]
    wp, bp = params["wp"], params["bp"]
    rescale = params["rescale"]
    cw1, cw2 = params["conv1"], params["conv2"]
    heads, d = params["heads"], params["dim_head"]

    B, H, W, C = x_in.shape
    n = H * W
    hd = heads * d
    assert hd == C, "pos_emb reshape requires dim == heads * dim_head"
    assert hd % 8 == 0, "q/k/v row slicing needs sublane-aligned heads*dim_head"
    assert n % 128 == 0, "single-block demo kernel assumes lane-aligned H*W"

    # Halo size for the conv scratch: must cover |di*W + dj| <= W + 1 and stay
    # lane-aligned (multiple of 128).
    P0 = max(128, -(-(W + 2) // 128) * 128)
    assert P0 >= W + 2

    # Fused QKV weight (bf16 operands, f32 accumulation happens in-kernel).
    wqkv = jnp.concatenate([wq, wk, wv], axis=1).astype(jnp.bfloat16)  # (C,3hd)
    # x lane-dense as (B, C, n): transpose done once in the wrapper (bf16
    # halves its HBM traffic); all in-kernel tiles are then lane-dense.
    x_t = jnp.transpose(x_in.reshape(B, n, C), (0, 2, 1)).astype(jnp.bfloat16)

    # Block-diagonal head masks for the batched (hd, hd) attention.
    head_id = jnp.arange(hd) // d
    same = head_id[:, None] == head_id[None, :]
    smask = jnp.where(same, rescale[head_id][:, None], 0.0).astype(jnp.float32)
    bmask = jnp.where(same, 0.0, -1e30).astype(jnp.float32)

    # Depthwise conv weights as (C, 9), tap index t = (di+1)*3 + (dj+1).
    w1 = cw1.reshape(C, 9).astype(jnp.float32)
    w2 = cw2.reshape(C, 9).astype(jnp.float32)

    # Column-wrap masks over the flattened spatial axis: row 0 for dj = -1
    # (valid when j >= 1), row 1 for dj = +1 (valid when j <= W-2).
    jj = jnp.arange(n) % W
    cmask = jnp.stack([(jj >= 1), (jj <= W - 2)], axis=0).astype(jnp.float32)

    # Generation-aware VMEM limit: ~96 MiB on v5e/v6e (128 MiB), 48 MiB on v7x.
    try:
        cap = int(pltpu.get_tpu_info().vmem_capacity_bytes)
        vmem_limit = min(cap * 3 // 4, 100 * 1024 * 1024)
    except Exception:
        vmem_limit = 48 * 1024 * 1024   # safe on every generation

    kernel = functools.partial(_ms_msa_kernel, heads=heads, dim_head=d,
                               H=H, W=W, P0=P0)
    out = pl.pallas_call(
        kernel,
        out_shape=jax.ShapeDtypeStruct((B, n, C), jnp.float32),
        grid=(B,),
        in_specs=[
            pl.BlockSpec((1, C, n), lambda i: (i, 0, 0)),      # x_t (bf16)
            pl.BlockSpec((C, 3 * hd), lambda i: (0, 0)),       # wqkv (bf16)
            pl.BlockSpec((hd, C), lambda i: (0, 0)),           # wp (bf16)
            pl.BlockSpec((C, 1), lambda i: (0, 0)),            # bp
            pl.BlockSpec((hd, hd), lambda i: (0, 0)),          # smask
            pl.BlockSpec((hd, hd), lambda i: (0, 0)),          # bmask
            pl.BlockSpec((C, 9), lambda i: (0, 0)),            # conv1 weights
            pl.BlockSpec((C, 9), lambda i: (0, 0)),            # conv2 weights
            pl.BlockSpec((2, n), lambda i: (0, 0)),            # column masks
        ],
        out_specs=pl.BlockSpec((1, n, C), lambda i: (i, 0, 0)),
        scratch_shapes=[pltpu.VMEM((C, 2 * P0 + n), jnp.float32)],  # halo buf
        compiler_params=pltpu.CompilerParams(
            dimension_semantics=("parallel",),
            vmem_limit_bytes=vmem_limit),
    )(x_t, wqkv, wp.astype(jnp.bfloat16),
      bp.reshape(C, 1).astype(jnp.float32), smask, bmask, w1, w2, cmask)

    # (B, n, C) -> (B, H, W, C) is a pure metadata reshape (no data movement).
    return out.reshape(B, H, W, C)


# ---------------------------------------------------------------------------
# Pure-JAX reference (mirrors the PyTorch forward semantics exactly).
# ---------------------------------------------------------------------------
def ms_msa_reference(x_in, params):
    wq, wk, wv = params["wq"], params["wk"], params["wv"]
    wp, bp = params["wp"], params["bp"]
    rescale = params["rescale"]
    cw1, cw2 = params["conv1"], params["conv2"]
    heads, d = params["heads"], params["dim_head"]

    B, H, W, C = x_in.shape
    n = H * W
    x = x_in.reshape(B, n, C)
    q, k, v = x @ wq, x @ wk, x @ wv

    def split_t(t):                               # b n (h d) -> b h d n
        return t.reshape(B, n, heads, d).transpose(0, 2, 3, 1)

    qt, kt, vt = split_t(q), split_t(k), split_t(v)
    qt = qt / jnp.maximum(jnp.linalg.norm(qt, axis=-1, keepdims=True), 1e-12)
    kt = kt / jnp.maximum(jnp.linalg.norm(kt, axis=-1, keepdims=True), 1e-12)
    attn = jnp.einsum("bhpn,bhen->bhpe", kt, qt)
    attn = attn * rescale[None, :, None, None]
    attn = jax.nn.softmax(attn, axis=-1)
    xo = jnp.einsum("bhpe,bhen->bhpn", attn, vt)  # (b, h, d, n)
    xo = xo.transpose(0, 3, 1, 2).reshape(B, n, heads * d)
    out_c = (xo @ wp + bp).reshape(B, H, W, C)

    def dwconv(img, w):                            # img NHWC, w (C, 3, 3)
        p = jnp.pad(img, ((0, 0), (1, 1), (1, 1), (0, 0)))
        acc = jnp.zeros_like(img)
        for di in range(3):
            for dj in range(3):
                acc = acc + (p[:, di:di + H, dj:dj + W, :]
                             * w[:, di, dj][None, None, None, :])
        return acc

    v_img = v.reshape(B, H, W, C)
    y = dwconv(v_img, cw1)
    y = jax.nn.gelu(y, approximate=False)
    out_p = dwconv(y, cw2)
    return out_c + out_p


if __name__ == "__main__":
    B, H, W = 2, 16, 16
    heads, dim_head = 2, 8
    dim = heads * dim_head        # pos_emb reshape requires dim == heads*dim_head
    hd = heads * dim_head

    key = jax.random.PRNGKey(0)
    ks = jax.random.split(key, 8)
    x_in = jax.random.normal(ks[0], (B, H, W, dim), dtype=jnp.float32)

    params = dict(
        heads=heads, dim_head=dim_head,
        wq=jax.random.normal(ks[1], (dim, hd), jnp.float32) / math.sqrt(dim),
        wk=jax.random.normal(ks[2], (dim, hd), jnp.float32) / math.sqrt(dim),
        wv=jax.random.normal(ks[3], (dim, hd), jnp.float32) / math.sqrt(dim),
        wp=jax.random.normal(ks[4], (hd, dim), jnp.float32) / math.sqrt(hd),
        bp=jax.random.normal(ks[5], (dim,), jnp.float32) * 0.02,
        rescale=jnp.linspace(0.5, 1.5, heads, dtype=jnp.float32),
        conv1=jax.random.normal(ks[6], (dim, 3, 3), jnp.float32) / 3.0,
        conv2=jax.random.normal(ks[7], (dim, 3, 3), jnp.float32) / 3.0,
    )

    out = ms_msa_forward(x_in, params)
    out = jax.block_until_ready(out)

    ref = ms_msa_reference(x_in, params)
    assert out.shape == (B, H, W, dim)
    assert bool(jnp.all(jnp.isfinite(out)))
    # Tolerance covers bf16 MXU operands throughout the attention path (f32
    # accumulation), the approximate softmax reciprocal, and the EUP divide in
    # the GELU erf polynomial.
    if not jnp.allclose(out, ref, rtol=3e-2, atol=3e-2):
        raise AssertionError(
            "mismatch vs reference, max abs diff = %e"
            % float(jnp.max(jnp.abs(out - ref))))
    print("KERNEL_OK")
</pallas_src>

<mosaic_0001>
module attributes {stable_mosaic.version = 11 : i64} {
  func.func @_ms_msa_kernel(%arg0: i32, %arg1: memref<1x16x256xbf16, #tpu.memory_space<vmem>>, %arg2: memref<16x48xbf16, #tpu.memory_space<vmem>>, %arg3: memref<16x16xbf16, #tpu.memory_space<vmem>>, %arg4: memref<16x1xf32, #tpu.memory_space<vmem>>, %arg5: memref<16x16xf32, #tpu.memory_space<vmem>>, %arg6: memref<16x16xf32, #tpu.memory_space<vmem>>, %arg7: memref<16x9xf32, #tpu.memory_space<vmem>>, %arg8: memref<16x9xf32, #tpu.memory_space<vmem>>, %arg9: memref<2x256xf32, #tpu.memory_space<vmem>>, %arg10: memref<1x256x16xf32, #tpu.memory_space<vmem>>, %arg11: memref<16x512xf32, #tpu.memory_space<vmem>>) attributes {dimension_semantics = [#tpu.dimension_semantics<parallel>], iteration_bounds = array<i64: 2>, scalar_prefetch = 0 : i64, scratch_operands = 1 : i64, tpu.core_type = #tpu.core_type<tc>, window_params = [{transform_indices = @transform_0, window_bounds = array<i64: 1, 16, 256>}, {pipeline_mode = #tpu.pipeline_mode<synchronous>, transform_indices = @transform_1, window_bounds = array<i64: 16, 48>}, {pipeline_mode = #tpu.pipeline_mode<synchronous>, transform_indices = @transform_2, window_bounds = array<i64: 16, 16>}, {pipeline_mode = #tpu.pipeline_mode<synchronous>, transform_indices = @transform_3, window_bounds = array<i64: 16, 1>}, {pipeline_mode = #tpu.pipeline_mode<synchronous>, transform_indices = @transform_4, window_bounds = array<i64: 16, 16>}, {pipeline_mode = #tpu.pipeline_mode<synchronous>, transform_indices = @transform_5, window_bounds = array<i64: 16, 16>}, {pipeline_mode = #tpu.pipeline_mode<synchronous>, transform_indices = @transform_6, window_bounds = array<i64: 16, 9>}, {pipeline_mode = #tpu.pipeline_mode<synchronous>, transform_indices = @transform_7, window_bounds = array<i64: 16, 9>}, {pipeline_mode = #tpu.pipeline_mode<synchronous>, transform_indices = @transform_8, window_bounds = array<i64: 2, 256>}, {transform_indices = @transform_9, window_bounds = array<i64: 1, 256, 16>}]} {
    %c0 = arith.constant 0 : index
    %c0_0 = arith.constant 0 : index
    %0 = vector.load %arg2[%c0, %c0_0] : memref<16x48xbf16, #tpu.memory_space<vmem>>, vector<16x48xbf16>
    %c0_1 = arith.constant 0 : index
    %c0_2 = arith.constant 0 : index
    %c0_3 = arith.constant 0 : index
    %1 = vector.load %arg1[%c0_1, %c0_2, %c0_3] : memref<1x16x256xbf16, #tpu.memory_space<vmem>>, vector<1x16x256xbf16>
    %2 = vector.shape_cast %1 : vector<1x16x256xbf16> to vector<16x256xbf16>
    %cst = arith.constant dense<0.000000e+00> : vector<48x256xf32>
    %3 = tpu.matmul %0, %2, %cst {dimension_numbers = #tpu.dot_dimension_numbers<[0], [0], [1], [1], [0, 1, 1, 1], [], []>} : vector<16x48xbf16>, vector<16x256xbf16>, vector<48x256xf32> -> vector<48x256xf32>
    %4 = vector.extract_strided_slice %3 {offsets = [0, 0], sizes = [16, 256], strides = [1, 1]} : vector<48x256xf32> to vector<16x256xf32>
    %5 = vector.extract_strided_slice %3 {offsets = [16, 0], sizes = [16, 256], strides = [1, 1]} : vector<48x256xf32> to vector<16x256xf32>
    %6 = vector.extract_strided_slice %3 {offsets = [32, 0], sizes = [16, 256], strides = [1, 1]} : vector<48x256xf32> to vector<16x256xf32>
    %7 = arith.mulf %4, %4 : vector<16x256xf32>
    %cst_4 = arith.constant dense<0.000000e+00> : vector<16xf32>
    %8 = vector.multi_reduction <add>, %7, %cst_4 [1] : vector<16x256xf32> to vector<16xf32>
    %9 = vector.shape_cast %8 : vector<16xf32> to vector<16x1xf32>
    %cst_5 = arith.constant 1.000000e-24 : f32
    %10 = vector.broadcast %cst_5 : f32 to vector<16x1xf32>
    %11 = arith.maximumf %9, %10 : vector<16x1xf32>
    %12 = math.rsqrt %11 : vector<16x1xf32>
    %13 = vector.broadcast %12 : vector<16x1xf32> to vector<16x256xf32>
    %14 = arith.mulf %4, %13 : vector<16x256xf32>
    %15 = arith.mulf %5, %5 : vector<16x256xf32>
    %cst_6 = arith.constant dense<0.000000e+00> : vector<16xf32>
    %16 = vector.multi_reduction <add>, %15, %cst_6 [1] : vector<16x256xf32> to vector<16xf32>
    %17 = vector.shape_cast %16 : vector<16xf32> to vector<16x1xf32>
    %cst_7 = arith.constant 1.000000e-24 : f32
    %18 = vector.broadcast %cst_7 : f32 to vector<16x1xf32>
    %19 = arith.maximumf %17, %18 : vector<16x1xf32>
    %20 = math.rsqrt %19 : vector<16x1xf32>
    %21 = vector.broadcast %20 : vector<16x1xf32> to vector<16x256xf32>
    %22 = arith.mulf %5, %21 : vector<16x256xf32>
    %23 = arith.truncf %22 : vector<16x256xf32> to vector<16x256xbf16>
    %24 = arith.truncf %14 : vector<16x256xf32> to vector<16x256xbf16>
    %cst_8 = arith.constant dense<0.000000e+00> : vector<16x16xf32>
    %25 = tpu.matmul %23, %24, %cst_8 {dimension_numbers = #tpu.dot_dimension_numbers<[1], [1], [0], [0], [0, 0, 1, 0], [], []>} : vector<16x256xbf16>, vector<16x256xbf16>, vector<16x16xf32> -> vector<16x16xf32>
    %c0_9 = arith.constant 0 : index
    %c0_10 = arith.constant 0 : index
    %26 = vector.load %arg5[%c0_9, %c0_10] : memref<16x16xf32, #tpu.memory_space<vmem>>, vector<16x16xf32>
    %27 = arith.mulf %25, %26 : vector<16x16xf32>
    %c0_11 = arith.constant 0 : index
    %c0_12 = arith.constant 0 : index
    %28 = vector.load %arg6[%c0_11, %c0_12] : memref<16x16xf32, #tpu.memory_space<vmem>>, vector<16x16xf32>
    %29 = arith.addf %27, %28 : vector<16x16xf32>
    %30 = math.exp %29 : vector<16x16xf32>
    %cst_13 = arith.constant dense<0.000000e+00> : vector<16xf32>
    %31 = vector.multi_reduction <add>, %30, %cst_13 [1] : vector<16x16xf32> to vector<16xf32>
    %32 = vector.shape_cast %31 : vector<16xf32> to vector<16x1xf32>
    %33 = tpu.reciprocal %32 {approx = true} : vector<16x1xf32> -> vector<16x1xf32>
    %34 = vector.broadcast %33 : vector<16x1xf32> to vector<16x16xf32>
    %35 = arith.mulf %30, %34 : vector<16x16xf32>
    %36 = arith.truncf %6 : vector<16x256xf32> to vector<16x256xbf16>
    %37 = arith.truncf %35 : vector<16x16xf32> to vector<16x16xbf16>
    %cst_14 = arith.constant dense<0.000000e+00> : vector<16x256xf32>
    %38 = tpu.matmul %37, %36, %cst_14 {dimension_numbers = #tpu.dot_dimension_numbers<[1], [0], [0], [1], [0, 0, 1, 1], [], []>} : vector<16x16xbf16>, vector<16x256xbf16>, vector<16x256xf32> -> vector<16x256xf32>
    %c0_15 = arith.constant 0 : index
    %c0_16 = arith.constant 0 : index
    %39 = vector.load %arg3[%c0_15, %c0_16] : memref<16x16xbf16, #tpu.memory_space<vmem>>, vector<16x16xbf16>
    %40 = arith.truncf %38 : vector<16x256xf32> to vector<16x256xbf16>
    %cst_17 = arith.constant dense<0.000000e+00> : vector<16x256xf32>
    %41 = tpu.matmul %39, %40, %cst_17 {dimension_numbers = #tpu.dot_dimension_numbers<[0], [0], [1], [1], [0, 1, 1, 1], [], []>} : vector<16x16xbf16>, vector<16x256xbf16>, vector<16x256xf32> -> vector<16x256xf32>
    %c0_18 = arith.constant 0 : index
    %c0_19 = arith.constant 0 : index
    %42 = vector.load %arg4[%c0_18, %c0_19] : memref<16x1xf32, #tpu.memory_space<vmem>>, vector<16x1xf32>
    %43 = vector.broadcast %42 : vector<16x1xf32> to vector<16x256xf32>
    %44 = arith.addf %41, %43 : vector<16x256xf32>
    %cst_20 = arith.constant 0.000000e+00 : f32
    %45 = vector.broadcast %cst_20 : f32 to vector<16x128xf32>
    %c0_21 = arith.constant 0 : index
    %c0_22 = arith.constant 0 : index
    %46 = vector.load %arg11[%c0_21, %c0_22] : memref<16x512xf32, #tpu.memory_space<vmem>>, vector<16x128xf32>
    tpu.vector_store %arg11[%c0_21, %c0_22], %45 {strides = array<i32>} : memref<16x512xf32, #tpu.memory_space<vmem>>, vector<16x128xf32>,
    %cst_23 = arith.constant 0.000000e+00 : f32
    %47 = vector.broadcast %cst_23 : f32 to vector<16x128xf32>
    %c0_24 = arith.constant 0 : index
    %c384 = arith.constant 384 : index
    %48 = vector.load %arg11[%c0_24, %c384] : memref<16x512xf32, #tpu.memory_space<vmem>>, vector<16x128xf32>
    tpu.vector_store %arg11[%c0_24, %c384], %47 {strides = array<i32>} : memref<16x512xf32, #tpu.memory_space<vmem>>, vector<16x128xf32>,
    %c0_25 = arith.constant 0 : index
    %c0_26 = arith.constant 0 : index
    %49 = vector.load %arg9[%c0_25, %c0_26] : memref<2x256xf32, #tpu.memory_space<vmem>>, vector<2x256xf32>
    %c0_27 = arith.constant 0 : index
    %c0_28 = arith.constant 0 : index
    %50 = vector.load %arg7[%c0_27, %c0_28] : memref<16x9xf32, #tpu.memory_space<vmem>>, vector<16x9xf32>
    %c0_29 = arith.constant 0 : index
    %c128 = arith.constant 128 : index
    %51 = vector.load %arg11[%c0_29, %c128] : memref<16x512xf32, #tpu.memory_space<vmem>>, vector<16x256xf32>
    tpu.vector_store %arg11[%c0_29, %c128], %6 {strides = array<i32>} : memref<16x512xf32, #tpu.memory_space<vmem>>, vector<16x256xf32>,
    %c0_30 = arith.constant 0 : index
    %c111 = arith.constant 111 : index
    %52 = vector.load %arg11[%c0_30, %c111] : memref<16x512xf32, #tpu.memory_space<vmem>>, vector<16x256xf32>
    %53 = vector.extract_strided_slice %50 {offsets = [0, 0], sizes = [16, 1], strides = [1, 1]} : vector<16x9xf32> to vector<16x1xf32>
    %54 = vector.broadcast %53 : vector<16x1xf32> to vector<16x256xf32>
    %55 = arith.mulf %52, %54 : vector<16x256xf32>
    %c0_31 = arith.constant 0 : index
    %c127 = arith.constant 127 : index
    %56 = vector.load %arg11[%c0_31, %c127] : memref<16x512xf32, #tpu.memory_space<vmem>>, vector<16x256xf32>
    %57 = vector.extract_strided_slice %50 {offsets = [0, 3], sizes = [16, 1], strides = [1, 1]} : vector<16x9xf32> to vector<16x1xf32>
    %58 = vector.broadcast %57 : vector<16x1xf32> to vector<16x256xf32>
    %59 = arith.mulf %56, %58 : vector<16x256xf32>
    %60 = arith.addf %55, %59 : vector<16x256xf32>
    %c0_32 = arith.constant 0 : index
    %c143 = arith.constant 143 : index
    %61 = vector.load %arg11[%c0_32, %c143] : memref<16x512xf32, #tpu.memory_space<vmem>>, vector<16x256xf32>
    %62 = vector.extract_strided_slice %50 {offsets = [0, 6], sizes = [16, 1], strides = [1, 1]} : vector<16x9xf32> to vector<16x1xf32>
    %63 = vector.broadcast %62 : vector<16x1xf32> to vector<16x256xf32>
    %64 = arith.mulf %61, %63 : vector<16x256xf32>
    %65 = arith.addf %60, %64 : vector<16x256xf32>
    %66 = vector.extract_strided_slice %49 {offsets = [0, 0], sizes = [1, 256], strides = [1, 1]} : vector<2x256xf32> to vector<1x256xf32>
    %67 = vector.broadcast %66 : vector<1x256xf32> to vector<16x256xf32>
    %68 = arith.mulf %65, %67 : vector<16x256xf32>
    %c0_33 = arith.constant 0 : index
    %c112 = arith.constant 112 : index
    %69 = vector.load %arg11[%c0_33, %c112] : memref<16x512xf32, #tpu.memory_space<vmem>>, vector<16x256xf32>
    %70 = vector.extract_strided_slice %50 {offsets = [0, 1], sizes = [16, 1], strides = [1, 1]} : vector<16x9xf32> to vector<16x1xf32>
    %71 = vector.broadcast %70 : vector<16x1xf32> to vector<16x256xf32>
    %72 = arith.mulf %69, %71 : vector<16x256xf32>
    %c0_34 = arith.constant 0 : index
    %c128_35 = arith.constant 128 : index
    %73 = vector.load %arg11[%c0_34, %c128_35] : memref<16x512xf32, #tpu.memory_space<vmem>>, vector<16x256xf32>
    %74 = vector.extract_strided_slice %50 {offsets = [0, 4], sizes = [16, 1], strides = [1, 1]} : vector<16x9xf32> to vector<16x1xf32>
    %75 = vector.broadcast %74 : vector<16x1xf32> to vector<16x256xf32>
    %76 = arith.mulf %73, %75 : vector<16x256xf32>
    %77 = arith.addf %72, %76 : vector<16x256xf32>
    %c0_36 = arith.constant 0 : index
    %c144 = arith.constant 144 : index
    %78 = vector.load %arg11[%c0_36, %c144] : memref<16x512xf32, #tpu.memory_space<vmem>>, vector<16x256xf32>
    %79 = vector.extract_strided_slice %50 {offsets = [0, 7], sizes = [16, 1], strides = [1, 1]} : vector<16x9xf32> to vector<16x1xf32>
    %80 = vector.broadcast %79 : vector<16x1xf32> to vector<16x256xf32>
    %81 = arith.mulf %78, %80 : vector<16x256xf32>
    %82 = arith.addf %77, %81 : vector<16x256xf32>
    %83 = arith.addf %68, %82 : vector<16x256xf32>
    %c0_37 = arith.constant 0 : index
    %c113 = arith.constant 113 : index
    %84 = vector.load %arg11[%c0_37, %c113] : memref<16x512xf32, #tpu.memory_space<vmem>>, vector<16x256xf32>
    %85 = vector.extract_strided_slice %50 {offsets = [0, 2], sizes = [16, 1], strides = [1, 1]} : vector<16x9xf32> to vector<16x1xf32>
    %86 = vector.broadcast %85 : vector<16x1xf32> to vector<16x256xf32>
    %87 = arith.mulf %84, %86 : vector<16x256xf32>
    %c0_38 = arith.constant 0 : index
    %c129 = arith.constant 129 : index
    %88 = vector.load %arg11[%c0_38, %c129] : memref<16x512xf32, #tpu.memory_space<vmem>>, vector<16x256xf32>
    %89 = vector.extract_strided_slice %50 {offsets = [0, 5], sizes = [16, 1], strides = [1, 1]} : vector<16x9xf32> to vector<16x1xf32>
    %90 = vector.broadcast %89 : vector<16x1xf32> to vector<16x256xf32>
    %91 = arith.mulf %88, %90 : vector<16x256xf32>
    %92 = arith.addf %87, %91 : vector<16x256xf32>
    %c0_39 = arith.constant 0 : index
    %c145 = arith.constant 145 : index
    %93 = vector.load %arg11[%c0_39, %c145] : memref<16x512xf32, #tpu.memory_space<vmem>>, vector<16x256xf32>
    %94 = vector.extract_strided_slice %50 {offsets = [0, 8], sizes = [16, 1], strides = [1, 1]} : vector<16x9xf32> to vector<16x1xf32>
    %95 = vector.broadcast %94 : vector<16x1xf32> to vector<16x256xf32>
    %96 = arith.mulf %93, %95 : vector<16x256xf32>
    %97 = arith.addf %92, %96 : vector<16x256xf32>
    %98 = vector.extract_strided_slice %49 {offsets = [1, 0], sizes = [1, 256], strides = [1, 1]} : vector<2x256xf32> to vector<1x256xf32>
    %99 = vector.broadcast %98 : vector<1x256xf32> to vector<16x256xf32>
    %100 = arith.mulf %97, %99 : vector<16x256xf32>
    %101 = arith.addf %83, %100 : vector<16x256xf32>
    %cst_40 = arith.constant 0.707106769 : f32
    %102 = vector.broadcast %cst_40 : f32 to vector<16x256xf32>
    %103 = arith.mulf %101, %102 : vector<16x256xf32>
    %104 = math.absf %103 : vector<16x256xf32>
    %cst_41 = arith.constant 0.327591091 : f32
    %105 = vector.broadcast %cst_41 : f32 to vector<16x256xf32>
    %106 = arith.mulf %105, %104 : vector<16x256xf32>
    %cst_42 = arith.constant 1.000000e+00 : f32
    %107 = vector.broadcast %cst_42 : f32 to vector<16x256xf32>
    %108 = arith.addf %107, %106 : vector<16x256xf32>
    %109 = tpu.reciprocal %108 {approx = true} : vector<16x256xf32> -> vector<16x256xf32>
    %cst_43 = arith.constant 1.06140542 : f32
    %110 = vector.broadcast %cst_43 : f32 to vector<16x256xf32>
    %111 = arith.mulf %109, %110 : vector<16x256xf32>
    %cst_44 = arith.constant -1.45315206 : f32
    %112 = vector.broadcast %cst_44 : f32 to vector<16x256xf32>
    %113 = arith.addf %112, %111 : vector<16x256xf32>
    %114 = arith.mulf %109, %113 : vector<16x256xf32>
    %cst_45 = arith.constant 1.42141378 : f32
    %115 = vector.broadcast %cst_45 : f32 to vector<16x256xf32>
    %116 = arith.addf %115, %114 : vector<16x256xf32>
    %117 = arith.mulf %109, %116 : vector<16x256xf32>
    %cst_46 = arith.constant -0.284496725 : f32
    %118 = vector.broadcast %cst_46 : f32 to vector<16x256xf32>
    %119 = arith.addf %118, %117 : vector<16x256xf32>
    %120 = arith.mulf %109, %119 : vector<16x256xf32>
    %cst_47 = arith.constant 0.254829586 : f32
    %121 = vector.broadcast %cst_47 : f32 to vector<16x256xf32>
    %122 = arith.addf %121, %120 : vector<16x256xf32>
    %123 = arith.mulf %109, %122 : vector<16x256xf32>
    %cst_48 = arith.constant 0.000000e+00 : f32
    %124 = vector.broadcast %cst_48 : f32 to vector<16x256xf32>
    %125 = arith.subf %124, %104 : vector<16x256xf32>
    %126 = arith.mulf %125, %104 : vector<16x256xf32>
    %127 = math.exp %126 : vector<16x256xf32>
    %128 = arith.mulf %123, %127 : vector<16x256xf32>
    %cst_49 = arith.constant 1.000000e+00 : f32
    %129 = vector.broadcast %cst_49 : f32 to vector<16x256xf32>
    %130 = arith.subf %129, %128 : vector<16x256xf32>
    %cst_50 = arith.constant 0.000000e+00 : f32
    %131 = vector.broadcast %cst_50 : f32 to vector<16x256xf32>
    %132 = arith.cmpf oge, %103, %131 : vector<16x256xf32>
    %cst_51 = arith.constant 0.000000e+00 : f32
    %133 = vector.broadcast %cst_51 : f32 to vector<16x256xf32>
    %134 = arith.subf %133, %130 : vector<16x256xf32>
    %135 = arith.select %132, %130, %134 : vector<16x256xi1>, vector<16x256xf32>
    %cst_52 = arith.constant 5.000000e-01 : f32
    %136 = vector.broadcast %cst_52 : f32 to vector<16x256xf32>
    %137 = arith.mulf %136, %101 : vector<16x256xf32>
    %cst_53 = arith.constant 1.000000e+00 : f32
    %138 = vector.broadcast %cst_53 : f32 to vector<16x256xf32>
    %139 = arith.addf %138, %135 : vector<16x256xf32>
    %140 = arith.mulf %137, %139 : vector<16x256xf32>
    %c0_54 = arith.constant 0 : index
    %c0_55 = arith.constant 0 : index
    %141 = vector.load %arg8[%c0_54, %c0_55] : memref<16x9xf32, #tpu.memory_space<vmem>>, vector<16x9xf32>
    %c0_56 = arith.constant 0 : index
    %c128_57 = arith.constant 128 : index
    %142 = vector.load %arg11[%c0_56, %c128_57] : memref<16x512xf32, #tpu.memory_space<vmem>>, vector<16x256xf32>
    tpu.vector_store %arg11[%c0_56, %c128_57], %140 {strides = array<i32>} : memref<16x512xf32, #tpu.memory_space<vmem>>, vector<16x256xf32>,
    %c0_58 = arith.constant 0 : index
    %c111_59 = arith.constant 111 : index
    %143 = vector.load %arg11[%c0_58, %c111_59] : memref<16x512xf32, #tpu.memory_space<vmem>>, vector<16x256xf32>
    %144 = vector.extract_strided_slice %141 {offsets = [0, 0], sizes = [16, 1], strides = [1, 1]} : vector<16x9xf32> to vector<16x1xf32>
    %145 = vector.broadcast %144 : vector<16x1xf32> to vector<16x256xf32>
    %146 = arith.mulf %143, %145 : vector<16x256xf32>
    %c0_60 = arith.constant 0 : index
    %c127_61 = arith.constant 127 : index
    %147 = vector.load %arg11[%c0_60, %c127_61] : memref<16x512xf32, #tpu.memory_space<vmem>>, vector<16x256xf32>
    %148 = vector.extract_strided_slice %141 {offsets = [0, 3], sizes = [16, 1], strides = [1, 1]} : vector<16x9xf32> to vector<16x1xf32>
    %149 = vector.broadcast %148 : vector<16x1xf32> to vector<16x256xf32>
    %150 = arith.mulf %147, %149 : vector<16x256xf32>
    %151 = arith.addf %146, %150 : vector<16x256xf32>
    %c0_62 = arith.constant 0 : index
    %c143_63 = arith.constant 143 : index
    %152 = vector.load %arg11[%c0_62, %c143_63] : memref<16x512xf32, #tpu.memory_space<vmem>>, vector<16x256xf32>
    %153 = vector.extract_strided_slice %141 {offsets = [0, 6], sizes = [16, 1], strides = [1, 1]} : vector<16x9xf32> to vector<16x1xf32>
    %154 = vector.broadcast %153 : vector<16x1xf32> to vector<16x256xf32>
    %155 = arith.mulf %152, %154 : vector<16x256xf32>
    %156 = arith.addf %151, %155 : vector<16x256xf32>
    %157 = vector.extract_strided_slice %49 {offsets = [0, 0], sizes = [1, 256], strides = [1, 1]} : vector<2x256xf32> to vector<1x256xf32>
    %158 = vector.broadcast %157 : vector<1x256xf32> to vector<16x256xf32>
    %159 = arith.mulf %156, %158 : vector<16x256xf32>
    %c0_64 = arith.constant 0 : index
    %c112_65 = arith.constant 112 : index
    %160 = vector.load %arg11[%c0_64, %c112_65] : memref<16x512xf32, #tpu.memory_space<vmem>>, vector<16x256xf32>
    %161 = vector.extract_strided_slice %141 {offsets = [0, 1], sizes = [16, 1], strides = [1, 1]} : vector<16x9xf32> to vector<16x1xf32>
    %162 = vector.broadcast %161 : vector<16x1xf32> to vector<16x256xf32>
    %163 = arith.mulf %160, %162 : vector<16x256xf32>
    %c0_66 = arith.constant 0 : index
    %c128_67 = arith.constant 128 : index
    %164 = vector.load %arg11[%c0_66, %c128_67] : memref<16x512xf32, #tpu.memory_space<vmem>>, vector<16x256xf32>
    %165 = vector.extract_strided_slice %141 {offsets = [0, 4], sizes = [16, 1], strides = [1, 1]} : vector<16x9xf32> to vector<16x1xf32>
    %166 = vector.broadcast %165 : vector<16x1xf32> to vector<16x256xf32>
    %167 = arith.mulf %164, %166 : vector<16x256xf32>
    %168 = arith.addf %163, %167 : vector<16x256xf32>
    %c0_68 = arith.constant 0 : index
    %c144_69 = arith.constant 144 : index
    %169 = vector.load %arg11[%c0_68, %c144_69] : memref<16x512xf32, #tpu.memory_space<vmem>>, vector<16x256xf32>
    %170 = vector.extract_strided_slice %141 {offsets = [0, 7], sizes = [16, 1], strides = [1, 1]} : vector<16x9xf32> to vector<16x1xf32>
    %171 = vector.broadcast %170 : vector<16x1xf32> to vector<16x256xf32>
    %172 = arith.mulf %169, %171 : vector<16x256xf32>
    %173 = arith.addf %168, %172 : vector<16x256xf32>
    %174 = arith.addf %159, %173 : vector<16x256xf32>
    %c0_70 = arith.constant 0 : index
    %c113_71 = arith.constant 113 : index
    %175 = vector.load %arg11[%c0_70, %c113_71] : memref<16x512xf32, #tpu.memory_space<vmem>>, vector<16x256xf32>
    %176 = vector.extract_strided_slice %141 {offsets = [0, 2], sizes = [16, 1], strides = [1, 1]} : vector<16x9xf32> to vector<16x1xf32>
    %177 = vector.broadcast %176 : vector<16x1xf32> to vector<16x256xf32>
    %178 = arith.mulf %175, %177 : vector<16x256xf32>
    %c0_72 = arith.constant 0 : index
    %c129_73 = arith.constant 129 : index
    %179 = vector.load %arg11[%c0_72, %c129_73] : memref<16x512xf32, #tpu.memory_space<vmem>>, vector<16x256xf32>
    %180 = vector.extract_strided_slice %141 {offsets = [0, 5], sizes = [16, 1], strides = [1, 1]} : vector<16x9xf32> to vector<16x1xf32>
    %181 = vector.broadcast %180 : vector<16x1xf32> to vector<16x256xf32>
    %182 = arith.mulf %179, %181 : vector<16x256xf32>
    %183 = arith.addf %178, %182 : vector<16x256xf32>
    %c0_74 = arith.constant 0 : index
    %c145_75 = arith.constant 145 : index
    %184 = vector.load %arg11[%c0_74, %c145_75] : memref<16x512xf32, #tpu.memory_space<vmem>>, vector<16x256xf32>
    %185 = vector.extract_strided_slice %141 {offsets = [0, 8], sizes = [16, 1], strides = [1, 1]} : vector<16x9xf32> to vector<16x1xf32>
    %186 = vector.broadcast %185 : vector<16x1xf32> to vector<16x256xf32>
    %187 = arith.mulf %184, %186 : vector<16x256xf32>
    %188 = arith.addf %183, %187 : vector<16x256xf32>
    %189 = vector.extract_strided_slice %49 {offsets = [1, 0], sizes = [1, 256], strides = [1, 1]} : vector<2x256xf32> to vector<1x256xf32>
    %190 = vector.broadcast %189 : vector<1x256xf32> to vector<16x256xf32>
    %191 = arith.mulf %188, %190 : vector<16x256xf32>
    %192 = arith.addf %174, %191 : vector<16x256xf32>
    %193 = arith.addf %44, %192 : vector<16x256xf32>
    %194 = tpu.iota {dimensions = array<i32: 0>} : vector<16x16xi32>
    %195 = tpu.iota {dimensions = array<i32: 1>} : vector<16x16xi32>
    %196 = arith.cmpi eq, %194, %195 : vector<16x16xi32>
    %197 = arith.extui %196 : vector<16x16xi1> to vector<16x16xi32>
    %198 = arith.sitofp %197 : vector<16x16xi32> to vector<16x16xf32>
    %cst_76 = arith.constant dense<0.000000e+00> : vector<256x16xf32>
    %199 = tpu.matmul %193, %198, %cst_76 {dimension_numbers = #tpu.dot_dimension_numbers<[0], [0], [1], [1], [0, 1, 1, 1], [], []>} : vector<16x256xf32>, vector<16x16xf32>, vector<256x16xf32> -> vector<256x16xf32>
    %c0_77 = arith.constant 0 : index
    %c0_78 = arith.constant 0 : index
    %c0_79 = arith.constant 0 : index
    %200 = vector.load %arg10[%c0_77, %c0_78, %c0_79] : memref<1x256x16xf32, #tpu.memory_space<vmem>>, vector<1x256x16xf32>
    %201 = vector.shape_cast %200 : vector<1x256x16xf32> to vector<256x16xf32>
    %202 = vector.shape_cast %199 : vector<256x16xf32> to vector<1x256x16xf32>
    tpu.vector_store %arg10[%c0_77, %c0_78, %c0_79], %202 {strides = array<i32>} : memref<1x256x16xf32, #tpu.memory_space<vmem>>, vector<1x256x16xf32>,
    return
  }
  func.func @transform_0(%arg0: i32) -> (i32, i32, i32) {
    %c0_i32 = arith.constant 0 : i32
    %c0_i32_0 = arith.constant 0 : i32
    %c0_i32_1 = arith.constant 0 : i32
    return %arg0, %c0_i32, %c0_i32_0 : i32, i32, i32
  }
  func.func @transform_1(%arg0: i32) -> (i32, i32) {
    %c0_i32 = arith.constant 0 : i32
    %c0_i32_0 = arith.constant 0 : i32
    %c0_i32_1 = arith.constant 0 : i32
    return %c0_i32, %c0_i32_0 : i32, i32
  }
  func.func @transform_2(%arg0: i32) -> (i32, i32) {
    %c0_i32 = arith.constant 0 : i32
    %c0_i32_0 = arith.constant 0 : i32
    %c0_i32_1 = arith.constant 0 : i32
    return %c0_i32, %c0_i32_0 : i32, i32
  }
  func.func @transform_3(%arg0: i32) -> (i32, i32) {
    %c0_i32 = arith.constant 0 : i32
    %c0_i32_0 = arith.constant 0 : i32
    %c0_i32_1 = arith.constant 0 : i32
    return %c0_i32, %c0_i32_0 : i32, i32
  }
  func.func @transform_4(%arg0: i32) -> (i32, i32) {
    %c0_i32 = arith.constant 0 : i32
    %c0_i32_0 = arith.constant 0 : i32
    %c0_i32_1 = arith.constant 0 : i32
    return %c0_i32, %c0_i32_0 : i32, i32
  }
  func.func @transform_5(%arg0: i32) -> (i32, i32) {
    %c0_i32 = arith.constant 0 : i32
    %c0_i32_0 = arith.constant 0 : i32
    %c0_i32_1 = arith.constant 0 : i32
    return %c0_i32, %c0_i32_0 : i32, i32
  }
  func.func @transform_6(%arg0: i32) -> (i32, i32) {
    %c0_i32 = arith.constant 0 : i32
    %c0_i32_0 = arith.constant 0 : i32
    %c0_i32_1 = arith.constant 0 : i32
    return %c0_i32, %c0_i32_0 : i32, i32
  }
  func.func @transform_7(%arg0: i32) -> (i32, i32) {
    %c0_i32 = arith.constant 0 : i32
    %c0_i32_0 = arith.constant 0 : i32
    %c0_i32_1 = arith.constant 0 : i32
    return %c0_i32, %c0_i32_0 : i32, i32
  }
  func.func @transform_8(%arg0: i32) -> (i32, i32) {
    %c0_i32 = arith.constant 0 : i32
    %c0_i32_0 = arith.constant 0 : i32
    %c0_i32_1 = arith.constant 0 : i32
    return %c0_i32, %c0_i32_0 : i32, i32
  }
  func.func @transform_9(%arg0: i32) -> (i32, i32, i32) {
    %c0_i32 = arith.constant 0 : i32
    %c0_i32_0 = arith.constant 0 : i32
    %c0_i32_1 = arith.constant 0 : i32
    return %arg0, %c0_i32, %c0_i32_0 : i32, i32, i32
  }
}

</mosaic_0001>

<bundles_post_ra>
// kernel: tpu_custom_call.1
= control target key start
LH: loop header
LB: loop body
LE: loop exit
PB: predicated region body
PF: predicated region fallthrough
CT: control target
= control target key end

     0   :  { %s4011_s0 = inlined_call_operand.hbm [shape: bf16[2,16,256], index: 0, kind: input, shape index: {}]   ;;  %s4012_s1 = inlined_call_operand.hbm [shape: bf16[16,48], index: 1, kind: input, shape index: {}]   ;;  %s4013_s2 = inlined_call_operand.hbm [shape: bf16[16,16], index: 2, kind: input, shape index: {}]   ;;  %s4014_s3 = inlined_call_operand.vmem [shape: f32[16,1], index: 3, kind: input, shape index: {}]   ;;  %s4015_s4 = inlined_call_operand.vmem [shape: f32[16,16], index: 4, kind: input, shape index: {}]   ;;  %s4016_s5 = inlined_call_operand.vmem [shape: f32[16,16], index: 5, kind: input, shape index: {}]   ;;  %s4017_s6 = inlined_call_operand.hbm [shape: f32[16,9], index: 6, kind: input, shape index: {}]   ;;  %s4018_s7 = inlined_call_operand.hbm [shape: f32[16,9], index: 7, kind: input, shape index: {}]   ;;  %s4019_s8 = inlined_call_operand.vmem [shape: f32[2,256], index: 8, kind: input, shape index: {}]   ;;  %s4020_s9 = inlined_call_operand.vmem [shape: f32[2,256,16], index: 9, kind: output, shape index: {}]  }
   0x1   :  { %4028 = sst [smem:[#allocation14_spill]] %s4012_s1 }
   0x2   :  { %14 = vsyncpa [#allocation4], 0 }
   0x3   :  { %16 = vsyncpa [#allocation4 + $0x1], 0 }
   0x4   :  { %17 = vsyncpa [#allocation6], 0 }
   0x5   :  { %18 = vsyncpa [#allocation9], 0  ;;  %s3011_s30 = smov 0   ;;  %s3013_s10 = smov 0  }
   0x6   :  { %s3015_s11 = smov 0   ;;  %s3017_s12 = smov 0  }
   0x7 LB: > { %s3030_s13 = sadd.s32 4294967295, %s2933_s12   ;;  %p44_p0 = scmp.ne.s32.totalorder %s2925_s10, %s2921_s30  ;;  %s2933_s12 = sphi %s3017_s12, %s4048_s12   ;;  %s2929_s11 = sphi %s3015_s11, %s4047_s11   ;;  %s2925_s10 = sphi %s3013_s10, %s4046_s10   ;;  %s2921_s30 = sphi %s3011_s30, %s4045_s30  }
   0x8   : > { %p4021_p1 = scmp.eq.s32.totalorder %s3030_s13, 0  ;;  %p2412_p2 = scmp.ge.s32.totalorder %s2933_s12, 1 }
   0x9   : > { %p249_p3 = scmp.lt.s32.totalorder %s2933_s12, 3  ;;  %s2935_s16 = smov [#allocation5]  }
   0xa   : > { %p3038_p4 = por %p4021_p1, %p44_p0  ;;  %s261_s17 = sshll.u32 %s2935_s16, 4  ;;  %s262_s17 = int_to_ptr.vmem [resolvable:$true] %s261_s17 }
   0xb   : > { %p3042_p5 = pnand %p2412_p2, %p249_p3  ;;  %s2936_s19 = smov [#allocation8]  }
   0xc   : > { %s4029_s14 = scalar_select %p3038_p4, 1, 0 }
   0xd   : > { %s4030_s15 = scalar_select %p3042_p5, 1, 0 }
   0xe   : > { %p2588_p6 = pneg %p3042_p5  ;;  %s296_s20 = sshll.u32 %s2936_s19, 4  ;;  %s3054_s20 = int_to_ptr.vmem [resolvable:$true] %s296_s20 }
   0xf   : > { %s4032_s1 = sld [smem:[#allocation14_spill]] }
  0x10   : > { %p3050_p7 = pnand %p2588_p6, %p4021_p1 }
  0x12   : > { %p3064_p9 = pneg %p3050_p7 }
  0x15   : > { %s2749_s23 = scalar_lea.hbm %s4032_s1, 128 }
  0x16   : > { %p2750_p8 = scmp.ne.s32.totalorder %s4032_s1, %s2749_s23  ;;  %p2756_p12 = scmp.lt.u32.totalorder %s2749_s23, %s4032_s1 }
  0x18   : > { %p2752_p10 = pnand %p3064_p9, %p2750_p8 }
  0x1a   : > { %p2753_p11 = pneg %p2752_p10 }
  0x1c   : > { %p2758_p13 = pnand %p2756_p12, %p2753_p11 }
  0x1e   : > { %2761 = shalt.err (!%p2758_p13)
}
  0x1f   : > { %s2762_s29 = scalar_lea.vmem %s262_s17, 128  ;;  %p2770_p6 = scmp.lt.s32.totalorder %s262_s17, %s262_s17 }
  0x20   : > { %p2763_p0 = scmp.ne.s32.totalorder %s262_s17, %s2762_s29  ;;  %p2771_p1 = scmp.lt.s32.totalorder %s2762_s29, %s2762_s29 }
  0x22   : > { %p2765_p2 = pnand %p2763_p0, %p3064_p9  ;;  %p2772_p4 = por %p2771_p1, %p2770_p6 }
  0x24   : > { %p2766_p3 = pneg %p2765_p2 }
  0x26   : > { %p2773_p5 = pnand %p2772_p4, %p2766_p3 }
  0x28   : > { %2776 = shalt.err (!%p2773_p5)
}
  0x29   : > { %s4024_s30 = smov 64   ;;  %s4025_s16 = smov 4  }
  0x2a   : > { %2591 = dma.hbm_to_vmem [thread:$0]  (!%p3050_p7), %s4032_s1, 128, %s262_s17, [#allocation6], %s4024_s30, %s4024_s30, %s4025_s16  }
  0x2b   : > { %s2777_s24 = scalar_lea.hbm %s4017_s6, 256 }
  0x2c   : > { %p2778_p1 = scmp.ne.s32.totalorder %s4017_s6, %s2777_s24  ;;  %p2784_p8 = scmp.lt.u32.totalorder %s2777_s24, %s4017_s6 }
  0x2e   : > { %p2780_p4 = pnand %p2778_p1, %p3064_p9 }
  0x30   : > { %p2781_p5 = pneg %p2780_p4 }
  0x32   : > { %p2786_p10 = pnand %p2784_p8, %p2781_p5 }
  0x34   : > { %2789 = shalt.err (!%p2786_p10)
}
  0x35   : > { %s2790_s17 = scalar_lea.vmem %s3054_s20, 256  ;;  %p2798_p0 = scmp.lt.s32.totalorder %s3054_s20, %s3054_s20 }
  0x36   : > { %p2791_p11 = scmp.ne.s32.totalorder %s3054_s20, %s2790_s17  ;;  %p2799_p2 = scmp.lt.s32.totalorder %s2790_s17, %s2790_s17 }
  0x38   : > { %p2793_p12 = pnand %p2791_p11, %p3064_p9  ;;  %p2800_p3 = por %p2799_p2, %p2798_p0 }
  0x3a   : > { %p2794_p13 = pneg %p2793_p12 }
  0x3c   : > { %p2801_p6 = pnand %p2800_p3, %p2794_p13 }
  0x3e   : > { %2804 = shalt.err (!%p2801_p6)
}
  0x3f   : > { %s4026_s19 = smov 128   ;;  %s2940_s21 = smov 8  }
  0x40   : > { %2597 = dma.hbm_to_vmem [thread:$0]  (!%p3050_p7), %s4017_s6, 256, %s3054_s20, [#allocation9], %s4026_s19, %s4026_s19, %s2940_s21  }
  0x41   : > { %s2941_s24 = smov [#allocation7]   ;;  %s2942_s27 = smov [#allocation10]  }
  0x42   : > { %s274_s25 = sshll.u32 %s2941_s24, 4  ;;  %s309_s28 = sshll.u32 %s2942_s27, 4  ;;  %s275_s25 = int_to_ptr.vmem [resolvable:$true] %s274_s25  ;;  %s3109_s28 = int_to_ptr.vmem [resolvable:$true] %s309_s28 }
  0x43   : > { %s2805_s30 = scalar_lea.hbm %s4013_s2, 128 }
  0x44   : > { %p2806_p1 = scmp.ne.s32.totalorder %s4013_s2, %s2805_s30  ;;  %p2812_p8 = scmp.lt.u32.totalorder %s2805_s30, %s4013_s2 }
  0x46   : > { %p2808_p4 = pnand %p2806_p1, %p3064_p9 }
  0x48   : > { %p2809_p5 = pneg %p2808_p4 }
  0x4a   : > { %p2814_p10 = pnand %p2812_p8, %p2809_p5 }
  0x4c   : > { %2817 = shalt.err (!%p2814_p10)
}
  0x4d   : > { %s2818_s23 = scalar_lea.vmem %s275_s25, 128  ;;  %p2826_p0 = scmp.lt.s32.totalorder %s275_s25, %s275_s25 }
  0x4e   : > { %p2819_p11 = scmp.ne.s32.totalorder %s275_s25, %s2818_s23  ;;  %p2827_p2 = scmp.lt.s32.totalorder %s2818_s23, %s2818_s23 }
  0x50   : > { %p2821_p12 = pnand %p2819_p11, %p3064_p9  ;;  %p2828_p3 = por %p2827_p2, %p2826_p0 }
  0x52   : > { %p2822_p13 = pneg %p2821_p12 }
  0x54   : > { %p2829_p6 = pnand %p2828_p3, %p2822_p13 }
  0x56   : > { %2832 = shalt.err (!%p2829_p6)
}
  0x57   : > { %s4034_s1 = smov 4   ;;  %s4035_s16 = smov 64  }
  0x58   : > { %2594 = dma.hbm_to_vmem [thread:$0]  (!%p3050_p7), %s4013_s2, 128, %s275_s25, [#allocation6], %s4035_s16, %s4035_s16, %s4034_s1  }
  0x59   : > { %s2833_s17 = scalar_lea.hbm %s4018_s7, 256 }
  0x5a   : > { %p2834_p1 = scmp.ne.s32.totalorder %s4018_s7, %s2833_s17  ;;  %p2840_p8 = scmp.lt.u32.totalorder %s2833_s17, %s4018_s7 }
  0x5c   : > { %p2836_p4 = pnand %p2834_p1, %p3064_p9 }
  0x5e   : > { %p2837_p5 = pneg %p2836_p4 }
  0x60   : > { %p2842_p10 = pnand %p2840_p8, %p2837_p5 }
  0x62   : > { %2845 = shalt.err (!%p2842_p10)
}
  0x63   : > { %s2846_s25 = scalar_lea.vmem %s3109_s28, 256  ;;  %p2854_p0 = scmp.lt.s32.totalorder %s3109_s28, %s3109_s28 }
  0x64   : > { %p2847_p11 = scmp.ne.s32.totalorder %s3109_s28, %s2846_s25  ;;  %p2855_p2 = scmp.lt.s32.totalorder %s2846_s25, %s2846_s25 }
  0x66   : > { %p2849_p12 = pnand %p2847_p11, %p3064_p9  ;;  %p2856_p3 = por %p2855_p2, %p2854_p0 }
  0x68   : > { %p2850_p13 = pneg %p2849_p12 }
  0x6a   : > { %p2857_p6 = pnand %p2856_p3, %p2850_p13 }
  0x6c   : > { %2860 = shalt.err (!%p2857_p6)
}
  0x6d   : > { %s4036_s19 = smov 128   ;;  %s3159_s26 = sadd.s32 1, %s2933_s12  }
  0x6e   : > { %2600 = dma.hbm_to_vmem [thread:$0]  (!%p3050_p7), %s4018_s7, 256, %s3109_s28, [#allocation9], %s4036_s19, %s4036_s19, %s2940_s21  }
  0x6f   : > { %s28_s18 = ssub.s32 %s2933_s12, %s3159_s26  ;;  %s31_s24 = sadd.s32 1, %s2929_s11 }
  0x70   : > { %p29_p9 = scmp.eq.s32.totalorder %s28_s18, 0  ;;  %p38_p1 = scmp.ne.s32.totalorder %s2929_s11, %s2925_s10 }
  0x71   : > { %p39_p4 = scmp.eq.s32.totalorder %s2933_s12, 0  ;;  %p2609_p8 = scmp.lt.s32.totalorder %s2933_s12, 2 }
  0x72   : > { %s3168_s30 = scalar_select %p29_p9, %s2929_s11, %s31_s24  }
  0x73   : > { %p40_p5 = por %p39_p4, %p38_p1  ;;  %s326_s27 = sand.u32 1, %s2929_s11  }
  0x74   : > { %s2476_s29 = sshll.u32 %s2933_s12, 8  ;;  %s2418_s17 = sshll.u32 %s326_s27, 4 }
  0x75   : > { %s3176_s23 = scalar_lea.hbm %s4011_s0, %s2476_s29  ;;  %s330_s28 = scalar_lea.vmem [#allocation3], %s2418_s17 }
  0x76   : > { %s337_s25 = sshll.u32 %s330_s28, 4  ;;  %p3178_p7 = pnand %p2609_p8, %p40_p5  ;;  %s3182_s25 = int_to_ptr.vmem [resolvable:$true] %s337_s25 }
  0x77   : > { %s3184_s12 = scalar_lea.sflag [#allocation4], %s326_s27  ;;  %s2861_s16 = scalar_lea.hbm %s3176_s23, 256 }
  0x78   : > { %p2862_p10 = scmp.ne.s32.totalorder %s3176_s23, %s2861_s16  ;;  %p2863_p11 = pneg %p3178_p7 }
  0x79   : > { %s2866_s29 = scalar_lea.hbm %s4011_s0, 512  ;;  %p2867_p0 = scmp.lt.u32.totalorder %s3176_s23, %s4011_s0 }
  0x7a   : > { %p2864_p12 = pnand %p2863_p11, %p2862_p10  ;;  %p2868_p2 = scmp.lt.u32.totalorder %s2866_s29, %s2861_s16 }
  0x7b   : > { %p2870_p6 = scmp.lt.u32.totalorder %s2861_s16, %s3176_s23 }
  0x7c   : > { %p2865_p13 = pneg %p2864_p12  ;;  %p2869_p3 = por %p2868_p2, %p2867_p0 }
  0x7e   : > { %p2871_p9 = por %p2870_p6, %p2869_p3 }
  0x80   : > { %p2872_p1 = pnand %p2871_p9, %p2865_p13 }
  0x82   : > { %2875 = shalt.err (!%p2872_p1)
}
  0x83   : > { %s2876_s27 = scalar_lea.vmem %s3182_s25, 256  ;;  %s2943_s20 = smov [#allocation3]  }
  0x84   : > { %p2877_p4 = scmp.ne.s32.totalorder %s3182_s25, %s2876_s27  ;;  %s2881_s28 = sshll.u32 %s2943_s20, 4  ;;  %s2882_s28 = int_to_ptr.vmem [resolvable:$false] %s2881_s28 }
  0x85   : > { %s2883_s18 = scalar_lea.vmem %s2882_s28, 512  ;;  %p2884_p10 = scmp.lt.s32.totalorder %s3182_s25, %s2882_s28 }
  0x86   : > { %p2879_p5 = pnand %p2877_p4, %p2863_p11  ;;  %p2885_p12 = scmp.lt.s32.totalorder %s2883_s18, %s2876_s27 }
  0x88   : > { %p2880_p8 = pneg %p2879_p5  ;;  %p2886_p0 = por %p2885_p12, %p2884_p10 }
  0x8a   : > { %p2887_p2 = pnand %p2886_p0, %p2880_p8 }
  0x8c   : > { %2890 = shalt.err (!%p2887_p2)
}
  0x8d   : > { %2604 = dma.hbm_to_vmem [thread:$0]  (!%p3178_p7), %s3176_s23, 256, %s3182_s25, %s3184_s12, %s4036_s19, %s4036_s19, %s2940_s21  }
  0x8e   : > { %p4038_p11 = scmp.ne.s32.totalorder %s4030_s15, 0 }
  0x8f   : > { %s351_s16 = sand.u32 (!%p4038_p11), 1, %s2925_s10   ;;  %p4039_p13 = scmp.ne.s32.totalorder (!%p4038_p11), %s4029_s14, 0 }
  0x90   : > { %349 = sbr.rel (%p4038_p11) target bundleno = 2240 (0x8c0), region = 56  ;;  %s2422_s24 = sshll.u32 (!%p4038_p11), %s351_s16, 4 }
  0x91   : > { %s352_s29 = scalar_lea.sflag (!%p4038_p11), [#allocation4], %s351_s16  ;;  %s355_s17 = scalar_lea.vmem (!%p4038_p11), [#allocation3], %s2422_s24 }
  0x97   : > { %2908 = dma.done.wait (%p4039_p13), %s352_s29, 256  }
  0x98   : > { %2910 = vsyncadd (%p4039_p13), %s352_s29, 4294967040  ;;  %p4040_p3 = scmp.eq.s32.totalorder %s3030_s13, 0 }
  0x9a   : > { %2912 = dma.done.wait (%p4040_p3), [#allocation6], 256   ;;  %p4041_p6 = pmov %p4040_p3 }
  0x9b   : > { %p4042_p7 = pmov %p4040_p3 }
  0x9c   : > { %2914 = vsyncadd (%p4041_p6), [#allocation6], 4294967040 }
  0x9d   : > { %2916 = dma.done.wait (%p4042_p7), [#allocation9], 512   ;;  %p4043_p9 = pmov %p4040_p3 }
  0x9e   : > { %v2944_v0 = vmov 0   ;;  %v2704_v1 = vld [vmem:[#allocation5] sm:$0xff]   ;;  %vm448_vm0 = vcmask 130048   ;;  %v3268_v27 = vld [vmem:[#allocation8] sm:$0xff]  ;;  %v2945_v28 = vmov 5   ;;  %v2946_v29 = vmov 4  }
  0x9f   : > { %2918 = vsyncadd (%p4043_p9), [#allocation9], 4294966784  ;;  %490 = vmatprep.mubr.bf16.mxu0 %v2944_v0  ;;  %v2705_v2 = vld [vmem:[%s355_s17 + $0x4] ss:$8 sps:$4 sm:$0xff]   ;;  %422 = vxpose.xlu0.c.b16.start.end [1/1] (short) (narrow) %v2704_v1, 48  ;;  %v2947_v31 = vmov 6  }
  0xa0   : > { %v2707_v3 = vld [vmem:[%s355_s17] ss:$8 sps:$4 sm:$0xff]   ;;  %458 = vmatprep.subr.bf16.mxu0 %v2705_v2  ;;  %2672 = vset.pattern.permute.xlu1 %v2946_v29  ;;  %v2948_v32 = vmov 7   ;;  %v2949_v33 = vmov 2   ;;  %v2950_v34 = vmov 8   ;;  %s2951_s14 = smov 112  }
  0xa1   : > { %459 = vmatpush1.bf16.msra.mxu0 %v2707_v3  ;;  %v3274_v30 = vld [vmem:[#allocation8 + $0x8] sm:$0xff]  ;;  %s2952_s15 = smov 96   ;;  %s2955_s18 = smov 113   ;;  %vm822_vm1 = vcmask 916480   ;;  %vm877_vm2 = vcmask 785408   ;;  %vm1199_vm3 = vcmask 924672  }
  0xa2   : > { %s2956_s16 = smov 111   ;;  %s2957_s24 = smov 127   ;;  %vm919_vm4 = vcmask 908288   ;;  %vm1048_vm5 = vcmask 1039360   ;;  %vm1228_vm6 = vcmask 1031168   ;;  %vm1421_vm13 = vcmask 138240  }
  0xa3   : > { %s2958_s29 = smov 126   ;;  %s2959_s17 = smov 17  }
  0xa4   : > { %p406_p1 = scmp.lt.s32.totalorder %s3030_s13, 1 }
  0xa6   : > { %s4050_s13 = smov (!%p406_p1, %s3030_s13), 1 }
  0xa7   : > { %s2477_s23 = sshll.u32 %s4050_s13, 8 }
  0xa8   : > { %2673 = vset.pattern.permute.xlu0 %v2945_v28  ;;  %s3932_s12 = scalar_lea.vmem %s4020_s9, %s2477_s23 }
 0x105   : > { %v430_v4 = vpop.trf.xlu0 }
 0x106   : > { %2432 = vmatmul.mubr.msk.bf16.vlgmr.msra.gmra.mrb[0].mxu0 %vm448_vm0, %v430_v4 }
 0x107   : > { %500 = vmatprep.mubr.bf16.mxu0 %v2944_v0 }
 0x109   : > { %v431_v5 = vpop.trf.xlu0 }
 0x10d   : > { %v432_v6 = vpop.trf.xlu0 }
 0x10e   : > { %2433 = vmatmul.mubr.msk.bf16.gmra.mrb[4].mxu0 %vm448_vm0, %v431_v5 }
 0x10f   : > { %510 = vmatprep.mubr.bf16.mxu0 %v2944_v0 }
 0x116   : > { %2434 = vmatmul.mubr.msk.bf16.gmra.mrb[8].mxu0 %vm448_vm0, %v432_v6 }
 0x1d9   : > { %v3236_v7 = vpop.f32.mrb[0].mxu0 }
 0x1da   : > { %v521_v8 = vmul.f32 %v3236_v7, %v3236_v7  ;;  %v3240_v9 = vpop.f32.mrb[1].mxu0 }
 0x1db   : > { %v522_v10 = vmul.f32 %v3240_v9, %v3240_v9  ;;  %v3244_v11 = vpop.f32.mrb[2].mxu0 }
 0x1dc   : > { %v523_v12 = vmul.f32 %v3244_v11, %v3244_v11  ;;  %v3248_v13 = vpop.f32.mrb[3].mxu0 }
 0x1dd   : > { %v524_v14 = vmul.f32 %v3248_v13, %v3248_v13  ;;  %v525_v15 = vadd.f32 %v522_v10, %v521_v8 }
 0x1df   : > { %526 = vadd.xlane.f32.xlu0 %v525_v15  ;;  %v528_v16 = vadd.f32 %v524_v14, %v523_v12 }
 0x1e1   : > { %529 = vadd.xlane.f32.xlu1 %v528_v16  ;;  %v3252_v17 = vpop.f32.mrb[4].mxu0 }
 0x1e2   : > { %v539_v18 = vmul.f32 %v3252_v17, %v3252_v17  ;;  %v3256_v19 = vpop.f32.mrb[5].mxu0 }
 0x1e3   : > { %v540_v20 = vmul.f32 %v3256_v19, %v3256_v19  ;;  %v3260_v21 = vpop.f32.mrb[6].mxu0 }
 0x1e4   : > { %v541_v22 = vmul.f32 %v3260_v21, %v3260_v21  ;;  %v3264_v23 = vpop.f32.mrb[7].mxu0 }
 0x1e5   : > { %v542_v24 = vmul.f32 %v3264_v23, %v3264_v23  ;;  %v543_v25 = vadd.f32 %v540_v20, %v539_v18  ;;  %v602_v18 = vld [vmem:[%s4015_s4] sm:$0xff] }
 0x1e6   : > { %v606_v20 = vld [vmem:[%s4016_s5] sm:$0xff] }
 0x1e7   : > { %544 = vadd.xlane.f32.xlu1 %v543_v25  ;;  %v546_v26 = vadd.f32 %v542_v24, %v541_v22  ;;  %v607_v25 = vld [vmem:[%s4016_s5 + $0x8] sm:$0xff] }
 0x1e9   : > { %v3292_v35 = vpop.f32.mrb[8].mxu0 }
 0x1ea   : > { %v3294_v36 = vpop.f32.mrb[9].mxu0 }
 0x1eb   : > { %547 = vadd.xlane.f32.xlu1 %v546_v26  ;;  %v3296_v37 = vpop.f32.mrb[10].mxu0 }
 0x1ec   : > { %v3298_v38 = vpop.f32.mrb[11].mxu0  ;;  %v624_v39 = vpack.c.bf16 %v3296_v37, %v3292_v35 }
 0x1ed   : > { %v625_v40 = vpack.c.bf16 %v3298_v38, %v3294_v36 }
 0x1f5   : > { %1080 = vperm.xlu0 %2673, %v3268_v27  }
 0x1f9   : > { %2680 = vset.pattern.permute.xlu0 %v2947_v31 }
 0x1fa   : > { %846 = vperm.xlu0 %2680, %v3268_v27  }
 0x1fc   : > { %945 = vperm.xlu1 %2672, %v3268_v27  }
 0x1fe   : > { %850 = vperm.xlu0 %2680, %v3274_v30  }
 0x200   : > { %949 = vperm.xlu1 %2672, %v3274_v30  }
 0x202   : > { %2684 = vset.pattern.permute.xlu0 %v2949_v33 }
 0x203   : > { %1070 = vperm.xlu0 %2684, %v3274_v30  }
 0x204   : > { %2674 = vset.pattern.permute.xlu1 %v2948_v32 }
 0x205   : > { %983 = vperm.xlu1 %2674, %v3268_v27  }
 0x207   : > { %2685 = vset.pattern.permute.xlu0 %v2944_v0 }
 0x209   : > { %2675 = vset.pattern.permute.xlu1 %v2945_v28 }
 0x20a   : > { %1084 = vperm.xlu1 %2675, %v3274_v30  }
 0x20e   : > { %2676 = vset.pattern.permute.xlu1 %v2950_v34 }
 0x20f   : > { %1128 = vperm.xlu1 %2676, %v3268_v27  }
 0x213   : > { %2677 = vset.pattern.permute.xlu1 %v2948_v32 }
 0x214   : > { %987 = vperm.xlu1 %2677, %v3274_v30  }
 0x218   : > { %2678 = vset.pattern.permute.xlu1 %v2950_v34 }
 0x26c   : > { %v527_v41 = vpop.xlane.xlu0 %526 }
 0x26d   : > { %v531_v42 = vmax.f32 %v527_v41, 1e-24 }
 0x26e   : > { %v530_v43 = vpop.xlane.xlu1 %529 }
 0x26f   : > { %2709 = vrsqrt.f32 %v531_v42  ;;  %v532_v44 = vmax.f32 %v530_v43, 1e-24 }
 0x271   : > { %2711 = vrsqrt.f32 %v532_v44 }
 0x274   : > { %v545_v45 = vpop.xlane.xlu1 %544  ;;  %v3312_v2 = vpop.permute.xlu0 %1080 }
 0x275   : > { %v549_v46 = vmax.f32 %v545_v45, 1e-24  ;;  %v1087_v4 = vmul.f32 %v3312_v2, %v3292_v35  ;;  %v1089_v5 = vmul.f32 0.0, %v3312_v2 }
 0x277   : > { %2713 = vrsqrt.f32 %v549_v46  ;;  %1099 = vrot.lane.b32.xlu0 %v1087_v4, %s2951_s14  ;;  %v3397_v4 = vld [vmem:[%s4019_s8] sm:$0xf] }
 0x278   : > { %v548_v47 = vpop.xlane.xlu1 %547 }
 0x279   : > { %v2710_v48 = vpop.eup %2709  ;;  %v550_v49 = vmax.f32 %v548_v47, 1e-24 }
 0x27a   : > { %v536_v51 = vmul.f32 %v2710_v48, %v3240_v9  ;;  %v535_v53 = vmul.f32 %v2710_v48, %v3236_v7  ;;  %v2953_v48 = vmov 3  }
 0x27b   : > { %v2712_v50 = vpop.eup %2711  ;;  %2715 = vrsqrt.f32 %v550_v49  ;;  %1103 = vrot.lane.b32.xlu0 %v1089_v5, %s2951_s14  ;;  %v2954_v49 = vmov 1  }
 0x27c   : > { %v538_v52 = vmul.f32 %v2712_v50, %v3248_v13  ;;  %v537_v54 = vmul.f32 %v2712_v50, %v3244_v11  ;;  %v3314_v3 = vpop.permute.xlu1 %945 }
 0x27d   : > { %v952_v50 = vmul.f32 %v3314_v3, %v3292_v35 }
 0x27e   : > { %v560_v55 = vpack.c.bf16 %v538_v52, %v536_v51  ;;  %v559_v56 = vpack.c.bf16 %v537_v54, %v535_v53  ;;  %v953_v51 = vmul.f32 %v3314_v3, %v3294_v36  ;;  %v1088_v52 = vmul.f32 %v3312_v2, %v3294_v36 }
 0x280   : > { %561 = vmatprep.subr.bf16.mxu1 %v560_v55  ;;  %v950_v6 = vpop.permute.xlu1 %949 }
 0x281   : > { %562 = vmatpush1.bf16.xpose.msra.mxu1 %v559_v56  ;;  %v2714_v57 = vpop.eup %2713  ;;  %v955_v7 = vmul.f32 %v950_v6, %v3298_v38  ;;  %v954_v53 = vmul.f32 %v950_v6, %v3296_v37 }
 0x282   : > { %630 = vmatprep.subr.bf16.mxu1 %v625_v40  ;;  %v554_v59 = vmul.f32 %v2714_v57, %v3256_v19  ;;  %v553_v61 = vmul.f32 %v2714_v57, %v3252_v17 }
 0x283   : > { %966 = vrot.lane.b32.xlu0 %v955_v7, %s2951_s14 }
 0x284   : > { %v984_v8 = vpop.permute.xlu1 %983 }
 0x285   : > { %v2716_v58 = vpop.eup %2715  ;;  %v991_v9 = vmul.f32 %v984_v8, %v3294_v36  ;;  %v990_v54 = vmul.f32 %v984_v8, %v3292_v35  ;;  %v992_v55 = vmul.f32 0.0, %v984_v8 }
 0x286   : > { %v556_v60 = vmul.f32 %v2716_v58, %v3264_v23  ;;  %v555_v62 = vmul.f32 %v2716_v58, %v3260_v21  ;;  %v603_v21 = vld [vmem:[%s4015_s4 + $0x8] sm:$0xff] }
 0x287   : > { %1004 = vrot.lane.b32.xlu0 %v991_v9, %s2952_s15 }
 0x288   : > { %v558_v63 = vpack.c.bf16 %v556_v60, %v554_v59  ;;  %v557_v1 = vpack.c.bf16 %v555_v62, %v553_v61  ;;  %v895_v60 = vlaneseq  ;;  %v3386_v61 = vpop.permute.xlu0 %846 }
 0x289   : > { %v1085_v10 = vpop.permute.xlu1 %1084 }
 0x28a   : > { %593 = vmatprep.mubr.bf16.mxu1 %v558_v63  ;;  %v1090_v11 = vmul.f32 %v1085_v10, %v3296_v37  ;;  %v1092_v12 = vmul.f32 0.0, %v1085_v10  ;;  %v1091_v56 = vmul.f32 %v1085_v10, %v3298_v38  ;;  %v3389_v62 = vshrl.u32 %v895_v60, 7 }
 0x28b   : > { %594 = vmatmul.mubr.bf16.vlgmr.msra.gmra.mrb[0].mxu1 %v557_v1 }
 0x28c   : > { %631 = vmatpush1.bf16.msra.mxu1 %v624_v39  ;;  %662 = vmatprep.mubr.bf16.mxu1 %v2944_v0  ;;  %v1177_v1 = vsub.s32 1, %v3389_v62  ;;  %v3392_v2 = vpop.permute.xlu0 %850  ;;  %v1181_v6 = vsub.s32 3, %v3389_v62 }
 0x28d   : > { %1105 = vrot.lane.b32.xlu0 %v1090_v11, %s2951_s14 }
 0x28e   : > { %v1129_v13 = vpop.permute.xlu1 %1128  ;;  %v1178_v5 = vrot.slane %v3397_v4, %v1177_v1 }
 0x28f   : > { %v1136_v14 = vmul.f32 %v1129_v13, %v3294_v36  ;;  %v1135_v57 = vmul.f32 %v1129_v13, %v3292_v35  ;;  %v1137_v58 = vmul.f32 0.0, %v1129_v13 }
 0x290   : > { %v3403_v10 = vpop.permute.xlu0 %1070  ;;  %v1188_v11 = vrot.slane %v1178_v5, %v1177_v1 }
 0x291   : > { %1109 = vrot.lane.b32.xlu0 %v1092_v12, %s2951_s14  ;;  %v1182_v12 = vrot.slane %v3397_v4, %v1181_v6 }
 0x293   : > { %v988_v15 = vpop.permute.xlu1 %987 }
 0x294   : > { %v993_v16 = vmul.f32 %v988_v15, %v3296_v37  ;;  %v995_v17 = vmul.f32 0.0, %v988_v15  ;;  %v994_v59 = vmul.f32 %v988_v15, %v3298_v38 }
 0x295   : > { %1149 = vrot.lane.b32.xlu0 %v1136_v14, %s2952_s15 }
 0x299   : > { %1008 = vrot.lane.b32.xlu0 %v993_v16, %s2952_s15 }
 0x29d   : > { %1012 = vrot.lane.b32.xlu0 %v995_v17, %s2952_s15 }
 0x2e9   : > { %v3408_v16 = vpop.permute.xlu0 %1099 }
 0x35e   : > { %v595_v19 = vpop.f32.mrb[0].mxu1 }
 0x35f   : > { %v604_v22 = vmul.f32 %v602_v18, %v595_v19  ;;  %v597_v23 = vpop.f32.mrb[1].mxu1  ;;  %v1192_v18 = vrot.slane %v1182_v12, %v1177_v1 }
 0x360   : > { %v598_v24 = vpop.f32.mrb[2].mxu1  ;;  %v3414_v23 = vpop.permute.xlu0 %1103 }
 0x361   : > { %v608_v26 = vadd.f32 %v606_v20, %v604_v22  ;;  %v605_v39 = vmul.f32 %v603_v21, %v598_v24  ;;  %v600_v40 = vpop.f32.mrb[3].mxu1 }
 0x363   : > { %v610_v41 = vmul.f32 1.442695, %v608_v26  ;;  %v609_v42 = vadd.f32 %v607_v25, %v605_v39 }
 0x364   : > { %v3422_v40 = vpop.permute.xlu0 %966 }
 0x365   : > { %2717 = vpow2.f32 %v610_v41  ;;  %v612_v43 = vmul.f32 1.442695, %v609_v42 }
 0x367   : > { %2719 = vpow2.f32 %v612_v43 }
 0x36f   : > { %v3346_v44 = vpop.eup %2717 }
 0x370   : > { %v614_v45 = vsel %vm448_vm0, %v3346_v44, 0.0 }
 0x371   : > { %v3350_v46 = vpop.eup %2719  ;;  %615 = vadd.xlane.f32.xlu1 %v614_v45  ;;  %v854_v45 = vmul.f32 %v3386_v61, %v3294_v36 }
 0x372   : > { %v617_v47 = vsel %vm448_vm0, %v3350_v46, 0.0 }
 0x375   : > { %618 = vadd.xlane.f32.xlu1 %v617_v47  ;;  %v901_v47 = vsub.s32 2, %v3389_v62 }
 0x386   : > { %1132 = vperm.xlu1 %2678, %v3274_v30  }
 0x38a   : > { %2679 = vset.pattern.permute.xlu1 %v2953_v48 }
 0x38b   : > { %791 = vperm.xlu1 %2679, %v3268_v27  }
 0x38f   : > { %795 = vperm.xlu1 %2679, %v3274_v30  }
 0x393   : > { %2681 = vset.pattern.permute.xlu1 %v2954_v49 }
 0x394   : > { %931 = vperm.xlu1 %2681, %v3268_v27  }
 0x398   : > { %2682 = vset.pattern.permute.xlu1 %v2949_v33 }
 0x399   : > { %1066 = vperm.xlu1 %2682, %v3268_v27  }
 0x39d   : > { %2683 = vset.pattern.permute.xlu1 %v2954_v49 }
 0x39e   : > { %935 = vperm.xlu1 %2683, %v3274_v30  }
 0x3a2   : > { %960 = vrot.lane.b32.xlu1 %v952_v50, %s2951_s14  ;;  %v853_v50 = vmul.f32 %v3386_v61, %v3292_v35 }
 0x3a3   : > { %2686 = vset.pattern.permute.xlu1 %v2944_v0 }
 0x3a6   : > { %962 = vrot.lane.b32.xlu1 %v953_v51, %s2951_s14  ;;  %v856_v51 = vmul.f32 %v3392_v2, %v3296_v37 }
 0x3aa   : > { %1101 = vrot.lane.b32.xlu1 %v1088_v52, %s2951_s14 }
 0x3ae   : > { %964 = vrot.lane.b32.xlu1 %v954_v53, %s2951_s14 }
 0x3b2   : > { %1002 = vrot.lane.b32.xlu1 %v990_v54, %s2952_s15  ;;  %v855_v54 = vmul.f32 0.0, %v3386_v61  ;;  %v857_v61 = vmul.f32 %v3392_v2, %v3298_v38 }
 0x3b6   : > { %1006 = vrot.lane.b32.xlu1 %v992_v55, %s2952_s15  ;;  %v858_v55 = vmul.f32 0.0, %v3392_v2 }
 0x3ba   : > { %1107 = vrot.lane.b32.xlu1 %v1091_v56, %s2951_s14  ;;  %v897_v56 = vsub.s32 0, %v3389_v62 }
 0x3be   : > { %1147 = vrot.lane.b32.xlu1 %v1135_v57, %s2952_s15  ;;  %v902_v57 = vrot.slane %v3397_v4, %v901_v47 }
 0x3c2   : > { %1151 = vrot.lane.b32.xlu1 %v1137_v58, %s2952_s15 }
 0x3c6   : > { %1010 = vrot.lane.b32.xlu1 %v994_v59, %s2952_s15  ;;  %v898_v59 = vrot.slane %v3397_v4, %v897_v56 }
 0x3c8   : > { %v908_v6 = vrot.slane %v898_v59, %v897_v56 }
 0x3fe   : > { %v616_v63 = vpop.xlane.xlu1 %615 }
 0x3ff   : > { %2721 = vrcp.f32 %v616_v63  ;;  %v912_v63 = vrot.slane %v902_v57, %v897_v56 }
 0x402   : > { %v619_v3 = vpop.xlane.xlu1 %618 }
 0x403   : > { %2723 = vrcp.f32 %v619_v3 }
 0x406   : > { %v1133_v7 = vpop.permute.xlu1 %1132 }
 0x407   : > { %v1138_v8 = vmul.f32 %v1133_v7, %v3296_v37  ;;  %v1139_v9 = vmul.f32 %v1133_v7, %v3298_v38  ;;  %v1140_v15 = vmul.f32 0.0, %v1133_v7 }
 0x409   : > { %1153 = vrot.lane.b32.xlu1 %v1138_v8, %s2952_s15  ;;  %1155 = vrot.lane.b32.xlu0 %v1139_v9, %s2952_s15  ;;  %v2722_v14 = vpop.eup %2721 }
 0x40a   : > { %v792_v13 = vpop.permute.xlu1 %791  ;;  %v622_v19 = vmul.f32 %v2722_v14, %v3346_v44 }
 0x40b   : > { %v799_v25 = vmul.f32 %v792_v13, %v3292_v35  ;;  %v798_v26 = vmul.f32 0.0, %v792_v13  ;;  %v800_v41 = vmul.f32 %v792_v13, %v3294_v36 }
 0x40d   : > { %v2724_v17 = vpop.eup %2723  ;;  %1157 = vrot.lane.b32.xlu1 %v1140_v15, %s2952_s15  ;;  %1195 = vrot.lane.b32.xlu0 %v1188_v11, %s2955_s18 }
 0x40e   : > { %v623_v20 = vmul.f32 %v2724_v17, %v3350_v46  ;;  %v796_v21 = vpop.permute.xlu1 %795 }
 0x40f   : > { %v801_v39 = vmul.f32 0.0, %v796_v21  ;;  %v803_v42 = vmul.f32 %v796_v21, %v3298_v38  ;;  %v802_v44 = vmul.f32 %v796_v21, %v3296_v37 }
 0x410   : > { %v626_v22 = vpack.c.bf16 %v623_v20, %v622_v19 }
 0x411   : > { %1197 = vrot.lane.b32.xlu1 %v1192_v18, %s2955_s18  ;;  %776 = vperm.xlu0 %2685, %v3268_v27  }
 0x412   : > { %2435 = vmatmul.mubr.msk.bf16.vlgmr.msra.gmra.mrb[4].mxu1 %vm448_vm0, %v626_v22 }
 0x413   : > { %v932_v24 = vpop.permute.xlu1 %931  ;;  %746 = vmatprep.mubr.bf16.mxu1 %v2944_v0 }
 0x414   : > { %v938_v3 = vmul.f32 0.0, %v932_v24  ;;  %v939_v8 = vmul.f32 %v932_v24, %v3292_v35  ;;  %v940_v15 = vmul.f32 %v932_v24, %v3294_v36 }
 0x415   : > { %781 = vperm.xlu1 %2686, %v3274_v30   ;;  %812 = vrot.lane.b32.xlu0 %v799_v25, %s2951_s14  ;;  %v1005_v30 = vpop.permute.xlu0 %1004 }
 0x416   : > { %2687 = vset.pattern.permute.xlu0 %v2945_v28 }
 0x418   : > { %v3424_v27 = vpop.permute.xlu1 %1066 }
 0x419   : > { %810 = vrot.lane.b32.xlu1 %v798_v26, %s2951_s14  ;;  %816 = vrot.lane.b32.xlu0 %v801_v39, %s2951_s14  ;;  %v3444_v52 = vpop.permute.xlu0 %1105  ;;  %v1073_v56 = vmul.f32 0.0, %v3424_v27 }
 0x41d   : > { %v3430_v43 = vpop.permute.xlu1 %935  ;;  %814 = vrot.lane.b32.xlu1 %v800_v41, %s2951_s14  ;;  %820 = vrot.lane.b32.xlu0 %v803_v42, %s2951_s14  ;;  %v3455_v1 = vpop.permute.xlu0 %1109 }
 0x41e   : > { %v941_v4 = vmul.f32 0.0, %v3430_v43  ;;  %v943_v41 = vmul.f32 %v3430_v43, %v3298_v38 }
 0x421   : > { %v961_v46 = vpop.permute.xlu1 %960  ;;  %818 = vrot.lane.b32.xlu1 %v802_v44, %s2951_s14  ;;  %867 = vrot.lane.b32.xlu0 %v854_v45, %s2952_s15  ;;  %v1150_v9 = vpop.permute.xlu0 %1149  ;;  %v942_v45 = vmul.f32 %v3430_v43, %v3296_v37  ;;  %v1121_v43 = vadd.f32 %v3408_v16, %v1073_v56 }
 0x422   : > { %v976_v11 = vadd.f32 %v961_v46, %v938_v3 }
 0x425   : > { %v963_v53 = vpop.permute.xlu1 %962  ;;  %865 = vrot.lane.b32.xlu1 %v853_v50, %s2952_s15  ;;  %871 = vrot.lane.b32.xlu0 %v856_v51, %s2952_s15  ;;  %v1009_v21 = vpop.permute.xlu0 %1008  ;;  %v981_v50 = vadd.f32 %v3422_v40, %v943_v41 }
 0x426   : > { %v968_v7 = vsel %vm822_vm1, %v961_v46, %v963_v53  ;;  %v978_v19 = vadd.f32 %v963_v53, %v940_v15 }
 0x427   : > { %v977_v12 = vadd.f32 %v968_v7, %v939_v8 }
 0x429   : > { %v1102_v58 = vpop.permute.xlu1 %1101  ;;  %869 = vrot.lane.b32.xlu1 %v855_v54, %s2952_s15  ;;  %875 = vrot.lane.b32.xlu0 %v858_v55, %s2952_s15 }
 0x42d   : > { %v965_v5 = vpop.permute.xlu1 %964  ;;  %873 = vrot.lane.b32.xlu1 %v857_v61, %s2952_s15  ;;  %917 = vrot.lane.b32.xlu0 %v912_v63, %s2956_s16  ;;  %v1112_v63 = vsel %vm822_vm1, %v1102_v58, %v3414_v23  ;;  %v1111_v61 = vsel %vm822_vm1, %v3408_v16, %v1102_v58 }
 0x42e   : > { %v979_v17 = vadd.f32 %v965_v5, %v941_v4  ;;  %v969_v44 = vsel %vm822_vm1, %v965_v5, %v3422_v40  ;;  %v1075_v40 = vmul.f32 %v3424_v27, %v3294_v36  ;;  %v1074_v5 = vmul.f32 %v3424_v27, %v3292_v35 }
 0x42f   : > { %v980_v46 = vadd.f32 %v969_v44, %v942_v45  ;;  %v1077_v27 = vmul.f32 %v3403_v10, %v3296_v37  ;;  %v3530_v44 = vld [vmem:[#allocation10 + $0x8] sm:$0xff] }
 0x430   : > { %v1027_v26 = vadd.f32 %v1009_v21, %v979_v17  ;;  %v1123_v4 = vadd.f32 %v1112_v63, %v1075_v40  ;;  %v2708_v45 = vld [vmem:[#allocation7] sm:$0xff]  }
 0x431   : > { %v1003_v13 = vpop.permute.xlu1 %1002  ;;  %915 = vrot.lane.b32.xlu1 %v908_v6, %s2956_s16 }
 0x432   : > { %v1014_v2 = vsel %vm877_vm2, %v1003_v13, %v1005_v30  ;;  %v1024_v14 = vadd.f32 %v1003_v13, %v976_v11  ;;  %v1122_v13 = vadd.f32 %v1111_v61, %v1074_v5 }
 0x433   : > { %v1025_v18 = vadd.f32 %v1014_v2, %v977_v12  ;;  %v1076_v12 = vmul.f32 0.0, %v3403_v10 }
 0x435   : > { %v1007_v20 = vpop.permute.xlu1 %1006  ;;  %1036 = vrot.lane.b32.xlu1 %v1024_v14, %s2957_s24  ;;  %1038 = vrot.lane.b32.xlu0 %v1025_v18, %s2957_s24 }
 0x436   : > { %v1015_v22 = vsel %vm877_vm2, %v1005_v30, %v1007_v20  ;;  %v1013_v30 = vpop.permute.xlu0 %1012  ;;  %v1078_v20 = vmul.f32 %v3403_v10, %v3298_v38 }
 0x437   : > { %v1026_v25 = vadd.f32 %v1015_v22, %v978_v19 }
 0x439   : > { %v1108_v39 = vpop.permute.xlu1 %1107  ;;  %1040 = vrot.lane.b32.xlu1 %v1026_v25, %s2957_s24  ;;  %1042 = vrot.lane.b32.xlu0 %v1027_v26, %s2957_s24 }
 0x43a   : > { %v1113_v16 = vsel %vm822_vm1, %v3444_v52, %v1108_v39  ;;  %v1114_v15 = vsel %vm822_vm1, %v1108_v39, %v3455_v1 }
 0x43b   : > { %v1125_v17 = vadd.f32 %v1113_v16, %v1077_v27  ;;  %v1126_v1 = vadd.f32 %v1114_v15, %v1078_v20 }
 0x43d   : > { %v1148_v24 = vpop.permute.xlu1 %1147 }
 0x43e   : > { %v1169_v3 = vadd.f32 %v1148_v24, %v1121_v43  ;;  %v1159_v11 = vsel %vm877_vm2, %v1148_v24, %v1150_v9 }
 0x43f   : > { %v1170_v2 = vadd.f32 %v1159_v11, %v1122_v13 }
 0x441   : > { %v1152_v42 = vpop.permute.xlu1 %1151 }
 0x442   : > { %v1160_v6 = vsel %vm877_vm2, %v1150_v9, %v1152_v42 }
 0x443   : > { %v1171_v58 = vadd.f32 %v1160_v6, %v1123_v4 }
 0x445   : > { %v1011_v47 = vpop.permute.xlu1 %1010 }
 0x446   : > { %v1016_v51 = vsel %vm877_vm2, %v1009_v21, %v1011_v47  ;;  %v1017_v53 = vsel %vm877_vm2, %v1011_v47, %v1013_v30  ;;  %v1124_v21 = vadd.f32 %v3444_v52, %v1076_v12  ;;  %v3525_v52 = vld [vmem:[#allocation10] sm:$0xff] }
 0x447   : > { %v1028_v54 = vadd.f32 %v1016_v51, %v980_v46  ;;  %v1029_v55 = vadd.f32 %v1017_v53, %v981_v50 }
 0x449   : > { %1044 = vrot.lane.b32.xlu1 %v1028_v54, %s2957_s24  ;;  %1046 = vrot.lane.b32.xlu0 %v1029_v55, %s2957_s24 }
 0x47b   : > { %v1154_v57 = vpop.permute.xlu1 %1153  ;;  %v1156_v59 = vpop.permute.xlu0 %1155 }
 0x47c   : > { %v1161_v14 = vsel %vm877_vm2, %v1154_v57, %v1156_v59  ;;  %v1172_v39 = vadd.f32 %v1154_v57, %v1124_v21 }
 0x47d   : > { %v1173_v25 = vadd.f32 %v1161_v14, %v1125_v17 }
 0x47f   : > { %v1158_v7 = vpop.permute.xlu1 %1157  ;;  %v3492_v8 = vpop.permute.xlu0 %1195 }
 0x480   : > { %v1204_v23 = vmul.f32 %v3492_v8, %v1169_v3  ;;  %v1162_v26 = vsel %vm877_vm2, %v1156_v59, %v1158_v7  ;;  %v1207_v42 = vmul.f32 %v3492_v8, %v1172_v39 }
 0x481   : > { %v1174_v41 = vadd.f32 %v1162_v26, %v1126_v1 }
 0x482   : > { %1216 = vrot.lane.b32.xlu1 %v1204_v23, %s2958_s29 }
 0x483   : > { %v3503_v9 = vpop.permute.xlu1 %1197 }
 0x484   : > { %v1206_v18 = vmul.f32 %v3503_v9, %v1171_v58  ;;  %v3510_v19 = vsel %vm1199_vm3, %v3492_v8, %v3503_v9  ;;  %v1209_v10 = vmul.f32 %v3503_v9, %v1174_v41 }
 0x485   : > { %v1205_v22 = vmul.f32 %v3510_v19, %v1170_v2  ;;  %v1208_v24 = vmul.f32 %v3510_v19, %v1173_v25 }
 0x486   : > { %1220 = vrot.lane.b32.xlu1 %v1206_v18, %s2958_s29 }
 0x487   : > { %1218 = vrot.lane.b32.xlu0 %v1205_v22, %s2958_s29 }
 0x48a   : > { %1224 = vrot.lane.b32.xlu1 %v1208_v24, %s2958_s29 }
 0x48b   : > { %1222 = vrot.lane.b32.xlu0 %v1207_v42, %s2958_s29 }
 0x48f   : > { %1226 = vrot.lane.b32.xlu0 %v1209_v10, %s2958_s29 }
 0x490   : > { %v777_v30 = vpop.permute.xlu0 %776 }
 0x491   : > { %v786_v23 = vmul.f32 %v777_v30, %v3294_v36  ;;  %v784_v13 = vmul.f32 0.0, %v777_v30  ;;  %v785_v14 = vmul.f32 %v777_v30, %v3292_v35 }
 0x493   : > { %1713 = vperm.xlu0 %2687, %v3525_v52  }
 0x494   : > { %v813_v50 = vpop.permute.xlu0 %812 }
 0x497   : > { %2688 = vset.pattern.permute.xlu0 %v2946_v29  ;;  %v3540_v29 = vpop.permute.xlu1 %781 }
 0x498   : > { %1579 = vperm.xlu0 %2688, %v3525_v52   ;;  %v787_v20 = vmul.f32 0.0, %v3540_v29 }
 0x49b   : > { %v811_v46 = vpop.permute.xlu1 %810 }
 0x49c   : > { %1583 = vperm.xlu0 %2688, %v3530_v44   ;;  %v823_v27 = vsel %vm822_vm1, %v811_v46, %v813_v50 }
 0x49d   : > { %v833_v21 = vadd.f32 %v823_v27, %v784_v13 }
 0x49f   : > { %v815_v47 = vpop.permute.xlu1 %814 }
 0x4a0   : > { %2689 = vset.pattern.permute.xlu0 %v2948_v32  ;;  %v835_v16 = vadd.f32 %v815_v47, %v786_v23  ;;  %v824_v58 = vsel %vm822_vm1, %v813_v50, %v815_v47 }
 0x4a1   : > { %1617 = vperm.xlu0 %2689, %v3525_v52   ;;  %v834_v36 = vadd.f32 %v824_v58, %v785_v14 }
 0x4a3   : > { %v3547_v51 = vpop.permute.xlu1 %818 }
 0x4a5   : > { %2691 = vset.pattern.permute.xlu0 %v2950_v34 }
 0x4a6   : > { %1761 = vperm.xlu0 %2691, %v3525_v52  }
 0x4a7   : > { %v866_v53 = vpop.permute.xlu1 %865 }
 0x4a8   : > { %v888_v1 = vadd.f32 %v866_v53, %v833_v21 }
 0x4aa   : > { %2694 = vset.pattern.permute.xlu0 %v2953_v48 }
 0x4ab   : > { %v870_v55 = vpop.permute.xlu1 %869 }
 0x4ad   : > { %695 = vxpose.xlu1.c.b16.start.end [1/1] (short) (narrow) %v2708_v45, 16  ;;  %v789_v45 = vmul.f32 %v3540_v29, %v3298_v38 }
 0x4af   : > { %v3551_v56 = vpop.permute.xlu1 %873 }
 0x4b1   : > { %2690 = vset.pattern.permute.xlu1 %v2945_v28  ;;  %v817_v28 = vpop.permute.xlu0 %816 }
 0x4b2   : > { %1717 = vperm.xlu1 %2690, %v3530_v44   ;;  %v825_v22 = vsel %vm822_vm1, %v817_v28, %v3547_v51 }
 0x4b3   : > { %v3555_v59 = vpop.permute.xlu1 %915  ;;  %v836_v41 = vadd.f32 %v825_v22, %v787_v20 }
 0x4b4   : > { %v924_v46 = vmul.f32 %v3555_v59, %v888_v1 }
 0x4b5   : > { %v3549_v54 = vpop.permute.xlu0 %820 }
 0x4b6   : > { %2692 = vset.pattern.permute.xlu1 %v2948_v32  ;;  %v838_v28 = vadd.f32 %v3549_v54, %v789_v45 }
 0x4b7   : > { %1621 = vperm.xlu1 %2692, %v3530_v44   ;;  %v1037_v63 = vpop.permute.xlu1 %1036 }
 0x4b9   : > { %v868_v32 = vpop.permute.xlu0 %867 }
 0x4ba   : > { %v879_v12 = vsel %vm877_vm2, %v868_v32, %v870_v55  ;;  %v878_v18 = vsel %vm877_vm2, %v866_v53, %v868_v32 }
 0x4bb   : > { %2693 = vset.pattern.permute.xlu1 %v2950_v34  ;;  %v1041_v4 = vpop.permute.xlu1 %1040  ;;  %v890_v15 = vadd.f32 %v879_v12, %v835_v16  ;;  %v889_v35 = vadd.f32 %v878_v18, %v834_v36  ;;  %v788_v12 = vmul.f32 %v3540_v29, %v3296_v37 }
 0x4bc   : > { %1765 = vperm.xlu1 %2693, %v3530_v44  }
 0x4bd   : > { %v3553_v57 = vpop.permute.xlu0 %871 }
 0x4be   : > { %v880_v14 = vsel %vm877_vm2, %v3553_v57, %v3551_v56 }
 0x4bf   : > { %v1045_v2 = vpop.permute.xlu1 %1044 }
 0x4c0   : > { %2695 = vset.pattern.permute.xlu1 %v2953_v48 }
 0x4c1   : > { %v876_v43 = vpop.permute.xlu0 %875 }
 0x4c5   : > { %v3557_v40 = vpop.permute.xlu0 %917 }
 0x4c6   : > { %v3570_v25 = vsel %vm919_vm4, %v3555_v59, %v3557_v40  ;;  %v926_v39 = vmul.f32 %v3557_v40, %v890_v15 }
 0x4c7   : > { %v925_v30 = vmul.f32 %v3570_v25, %v889_v35 }
 0x4c8   : > { %v1061_v47 = vadd.f32 %v1041_v4, %v926_v39 }
 0x4c9   : > { %v1039_v11 = vpop.permute.xlu0 %1038 }
 0x4ca   : > { %v1049_v42 = vsel %vm1048_vm5, %v1037_v63, %v1039_v11  ;;  %v1050_v10 = vsel %vm1048_vm5, %v1039_v11, %v1041_v4  ;;  %v891_v63 = vadd.f32 %v3553_v57, %v836_v41  ;;  %v826_v11 = vsel %vm822_vm1, %v3547_v51, %v3549_v54 }
 0x4cb   : > { %v1059_v53 = vadd.f32 %v1049_v42, %v924_v46  ;;  %v1060_v55 = vadd.f32 %v1050_v10, %v925_v30 }
 0x4cc   : > { %v927_v23 = vmul.f32 %v3555_v59, %v891_v63 }
 0x4cd   : > { %v1043_v17 = vpop.permute.xlu0 %1042 }
 0x4d1   : > { %v1047_v24 = vpop.permute.xlu0 %1046 }
 0x4e5   : > { %v664_v48 = vpop.f32.mrb[4].mxu1 }
 0x4e6   : > { %v666_v61 = vpop.f32.mrb[5].mxu1 }
 0x4e7   : > { %v668_v3 = vpop.f32.mrb[6].mxu1 }
 0x4e8   : > { %v675_v5 = vpack.c.bf16 %v668_v3, %v664_v48  ;;  %v670_v6 = vpop.f32.mrb[7].mxu1 }
 0x4e9   : > { %v676_v7 = vpack.c.bf16 %v670_v6, %v666_v61  ;;  %v881_v61 = vsel %vm877_vm2, %v3551_v56, %v876_v43  ;;  %v1052_v56 = vsel %vm1048_vm5, %v1045_v2, %v1047_v24 }
 0x4ea   : > { %v893_v13 = vadd.f32 %v881_v61, %v838_v28 }
 0x4eb   : > { %714 = vmatprep.subr.bf16.mxu1 %v676_v7 }
 0x4ec   : > { %715 = vmatpush1.bf16.msra.mxu1 %v675_v5  ;;  %v1051_v5 = vsel %vm1048_vm5, %v1043_v17, %v1045_v2  ;;  %v837_v17 = vadd.f32 %v826_v11, %v788_v12  ;;  %v929_v36 = vmul.f32 %v3557_v40, %v893_v13 }
 0x4ed   : > { %v1062_v15 = vadd.f32 %v1051_v5, %v927_v23 }
 0x4ee   : > { %v892_v21 = vadd.f32 %v880_v14, %v837_v17  ;;  %v1064_v39 = vadd.f32 %v1047_v24, %v929_v36 }
 0x4f0   : > { %v928_v41 = vmul.f32 %v3570_v25, %v892_v21 }
 0x4f2   : > { %v1063_v46 = vadd.f32 %v1052_v56, %v928_v41 }
 0x4f4   : > { %v1217_v26 = vpop.permute.xlu1 %1216 }
 0x4f8   : > { %v1221_v50 = vpop.permute.xlu1 %1220 }
 0x4f9   : > { %v3580_v32 = vadd.f32 %v1221_v50, %v1061_v47  ;;  %v1219_v48 = vpop.permute.xlu0 %1218 }
 0x4fa   : > { %v1229_v38 = vsel %vm1228_vm6, %v1217_v26, %v1219_v48  ;;  %v1230_v3 = vsel %vm1228_vm6, %v1219_v48, %v1221_v50 }
 0x4fb   : > { %v3589_v6 = vmul.f32 0.70710677, %v3580_v32  ;;  %v3591_v7 = vadd.f32 %v1229_v38, %v1059_v53  ;;  %v3593_v4 = vadd.f32 %v1230_v3, %v1060_v55 }
 0x4fc   : > { %v1225_v43 = vpop.permute.xlu1 %1224 }
 0x4fd   : > { %v1253_v16 = vand.u32 2147483647, %v3589_v6  ;;  %v3603_v27 = vmul.f32 0.70710677, %v3591_v7  ;;  %v1223_v58 = vpop.permute.xlu0 %1222  ;;  %v3609_v51 = vmul.f32 0.70710677, %v3593_v4 }
 0x4fe   : > { %v1231_v54 = vsel %vm1228_vm6, %v1223_v58, %v1225_v43  ;;  %vm1367_vm7 = vcmp.ge.f32.partialorder %v3589_v6, 0.0 }
 0x4ff   : > { %v1259_v18 = vmul.f32 0.3275911, %v1253_v16  ;;  %v1251_v37 = vand.u32 2147483647, %v3603_v27  ;;  %v1252_v29 = vand.u32 2147483647, %v3609_v51  ;;  %v3614_v20 = vadd.f32 %v1231_v54, %v1062_v15 }
 0x500   : > { %v1331_v24 = vsub.f32 0.0, %v1253_v16  ;;  %vm1365_vm8 = vcmp.ge.f32.partialorder %v3603_v27, 0.0  ;;  %vm1366_vm9 = vcmp.ge.f32.partialorder %v3609_v51, 0.0 }
 0x501   : > { %v1265_v22 = vadd.f32 1.0, %v1259_v18  ;;  %v1257_v26 = vmul.f32 0.3275911, %v1251_v37  ;;  %v1258_v57 = vmul.f32 0.3275911, %v1252_v29  ;;  %v1227_v35 = vpop.permute.xlu0 %1226  ;;  %v1329_v3 = vsub.f32 0.0, %v1251_v37 }
 0x502   : > { %v3619_v1 = vmul.f32 0.70710677, %v3614_v20  ;;  %v1232_v30 = vsel %vm1228_vm6, %v1225_v43, %v1227_v35  ;;  %v3624_v47 = vadd.f32 %v1227_v35, %v1064_v39  ;;  %v1337_v38 = vmul.f32 %v1331_v24, %v1253_v16 }
 0x503   : > { %2725 = vrcp.f32 %v1265_v22  ;;  %v1263_v42 = vadd.f32 1.0, %v1257_v26  ;;  %v1264_v10 = vadd.f32 1.0, %v1258_v57  ;;  %v3626_v50 = vadd.f32 %v1232_v30, %v1063_v46 }
 0x504   : > { %v1254_v45 = vand.u32 2147483647, %v3619_v1  ;;  %v3629_v28 = vmul.f32 0.70710677, %v3624_v47  ;;  %v1330_v11 = vsub.f32 0.0, %v1252_v29  ;;  %v1335_v54 = vmul.f32 %v1329_v3, %v1251_v37 }
 0x505   : > { %2727 = vrcp.f32 %v1263_v42  ;;  %v3632_v55 = vmul.f32 0.70710677, %v3626_v50  ;;  %v1345_v15 = vmul.f32 1.442695, %v1337_v38  ;;  %vm1368_vm10 = vcmp.ge.f32.partialorder %v3619_v1, 0.0 }
 0x506   : > { %v1260_v2 = vmul.f32 0.3275911, %v1254_v45  ;;  %2729 = vrcp.f32 %v1264_v10  ;;  %v1256_v48 = vand.u32 2147483647, %v3629_v28  ;;  %v1332_v13 = vsub.f32 0.0, %v1254_v45 }
 0x507   : > { %v1255_v63 = vand.u32 2147483647, %v3632_v55  ;;  %v1336_v21 = vmul.f32 %v1330_v11, %v1252_v29  ;;  %v1341_v39 = vmul.f32 1.442695, %v1335_v54  ;;  %vm1370_vm11 = vcmp.ge.f32.partialorder %v3629_v28, 0.0 }
 0x508   : > { %v1266_v53 = vadd.f32 1.0, %v1260_v2  ;;  %v1262_v61 = vmul.f32 0.3275911, %v1256_v48  ;;  %v1338_v26 = vmul.f32 %v1332_v13, %v1254_v45  ;;  %v1334_v10 = vsub.f32 0.0, %v1256_v48 }
 0x509   : > { %v1261_v23 = vmul.f32 0.3275911, %v1255_v63  ;;  %v1343_v42 = vmul.f32 1.442695, %v1336_v21  ;;  %vm1369_vm12 = vcmp.ge.f32.partialorder %v3632_v55, 0.0 }
 0x50a   : > { %2731 = vrcp.f32 %v1266_v53  ;;  %v1268_v43 = vadd.f32 1.0, %v1262_v61  ;;  %v1347_v24 = vmul.f32 1.442695, %v1338_v26  ;;  %v1333_v61 = vsub.f32 0.0, %v1255_v63 }
 0x50b   : > { %v1267_v58 = vadd.f32 1.0, %v1261_v23 }
 0x50c   : > { %2733 = vrcp.f32 %v1268_v43  ;;  %v1340_v43 = vmul.f32 %v1334_v10, %v1256_v48 }
 0x50d   : > { %v3636_v5 = vpop.eup %2725  ;;  %2735 = vrcp.f32 %v1267_v58 }
 0x50e   : > { %v1277_v12 = vmul.f32 1.0614054, %v3636_v5  ;;  %2737 = vpow2.f32 %v1345_v15  ;;  %v1351_v48 = vmul.f32 1.442695, %v1340_v43 }
 0x50f   : > { %v3639_v14 = vpop.eup %2727  ;;  %2739 = vpow2.f32 %v1341_v39 }
 0x510   : > { %v1283_v17 = vadd.f32 -1.4531521, %v1277_v12  ;;  %v3641_v18 = vpop.eup %2729  ;;  %v1275_v16 = vmul.f32 1.0614054, %v3639_v14  ;;  %2741 = vpow2.f32 %v1343_v42 }
 0x511   : > { %v1276_v36 = vmul.f32 1.0614054, %v3641_v18  ;;  %2743 = vpow2.f32 %v1347_v24 }
 0x512   : > { %v1289_v22 = vmul.f32 %v3636_v5, %v1283_v17  ;;  %v1281_v56 = vadd.f32 -1.4531521, %v1275_v16  ;;  %2745 = vpow2.f32 %v1351_v48 }
 0x513   : > { %v703_v57 = vpop.trf.xlu1  ;;  %v1282_v41 = vadd.f32 -1.4531521, %v1276_v36  ;;  %v1339_v36 = vmul.f32 %v1333_v61, %v1255_v63 }
 0x514   : > { %v3646_v35 = vpop.eup %2731  ;;  %v1295_v37 = vadd.f32 1.4214138, %v1289_v22  ;;  %2437 = vmatmul.mubr.msk.bf16.vlgmr.msra.gmra.mrb[8].mxu1 %vm448_vm0, %v703_v57  ;;  %v1287_v46 = vmul.f32 %v3639_v14, %v1281_v56 }
 0x515   : > { %v1278_v29 = vmul.f32 1.0614054, %v3646_v35  ;;  %v1288_v30 = vmul.f32 %v3641_v18, %v1282_v41 }
 0x516   : > { %v1301_v45 = vmul.f32 %v3636_v5, %v1295_v37  ;;  %v1293_v53 = vadd.f32 1.4214138, %v1287_v46  ;;  %v3653_v11 = vpop.eup %2733 }
 0x517   : > { %v1284_v2 = vadd.f32 -1.4531521, %v1278_v29  ;;  %v1294_v38 = vadd.f32 1.4214138, %v1288_v30  ;;  %v1280_v13 = vmul.f32 1.0614054, %v3653_v11  ;;  %v3660_v54 = vpop.eup %2735 }
 0x518   : > { %v1307_v3 = vadd.f32 -0.28449672, %v1301_v45  ;;  %v1299_v12 = vmul.f32 %v3639_v14, %v1293_v53  ;;  %v1279_v39 = vmul.f32 1.0614054, %v3660_v54  ;;  %v2738_v41 = vpop.eup %2737  ;;  %v1349_v45 = vmul.f32 1.442695, %v1339_v36 }
 0x519   : > { %v1290_v23 = vmul.f32 %v3646_v35, %v1284_v2  ;;  %v1300_v58 = vmul.f32 %v3641_v18, %v1294_v38  ;;  %v1286_v16 = vadd.f32 -1.4531521, %v1280_v13 }
 0x51a   : > { %v1313_v15 = vmul.f32 %v3636_v5, %v1307_v3  ;;  %v1305_v21 = vadd.f32 -0.28449672, %v1299_v12  ;;  %v1285_v30 = vadd.f32 -1.4531521, %v1279_v39  ;;  %v2740_v3 = vpop.eup %2739  ;;  %2747 = vpow2.f32 %v1349_v45 }
 0x51b   : > { %v1296_v17 = vadd.f32 1.4214138, %v1290_v23  ;;  %v1306_v22 = vadd.f32 -0.28449672, %v1300_v58  ;;  %v1292_v37 = vmul.f32 %v3653_v11, %v1286_v16  ;;  %v2742_v12 = vpop.eup %2741 }
 0x51c   : > { %v1319_v26 = vadd.f32 0.2548296, %v1313_v15  ;;  %v1311_v57 = vmul.f32 %v3639_v14, %v1305_v21  ;;  %v1291_v38 = vmul.f32 %v3660_v54, %v1285_v30  ;;  %v2744_v16 = vpop.eup %2743 }
 0x51d   : > { %v1302_v56 = vmul.f32 %v3646_v35, %v1296_v17  ;;  %v1312_v42 = vmul.f32 %v3641_v18, %v1306_v22  ;;  %v1298_v63 = vadd.f32 1.4214138, %v1292_v37  ;;  %v2746_v45 = vpop.eup %2745 }
 0x51e   : > { %v1325_v29 = vmul.f32 %v3636_v5, %v1319_v26  ;;  %v1317_v46 = vadd.f32 0.2548296, %v1311_v57  ;;  %v1297_v15 = vadd.f32 1.4214138, %v1291_v38 }
 0x51f   : > { %v1308_v10 = vadd.f32 -0.28449672, %v1302_v56  ;;  %v1318_v2 = vadd.f32 0.2548296, %v1312_v42  ;;  %v1304_v23 = vmul.f32 %v3653_v11, %v1298_v63 }
 0x520   : > { %v1355_v24 = vmul.f32 %v2738_v41, %v1325_v29  ;;  %v1323_v61 = vmul.f32 %v3639_v14, %v1317_v46  ;;  %v1303_v26 = vmul.f32 %v3660_v54, %v1297_v15  ;;  %v1383_v46 = vmul.f32 0.5, %v3591_v7 }
 0x521   : > { %v1314_v53 = vmul.f32 %v3646_v35, %v1308_v10  ;;  %v1324_v43 = vmul.f32 %v3641_v18, %v1318_v2  ;;  %v1310_v17 = vadd.f32 -0.28449672, %v1304_v23  ;;  %v1384_v2 = vmul.f32 0.5, %v3593_v4 }
 0x522   : > { %v1361_v5 = vsub.f32 1.0, %v1355_v24  ;;  %v1353_v58 = vmul.f32 %v2740_v3, %v1323_v61  ;;  %v1309_v39 = vadd.f32 -0.28449672, %v1303_v26  ;;  %v1714_v26 = vpop.permute.xlu0 %1713 }
 0x523   : > { %v1320_v13 = vadd.f32 0.2548296, %v1314_v53  ;;  %v1354_v21 = vmul.f32 %v2742_v12, %v1324_v43  ;;  %v1316_v56 = vmul.f32 %v3653_v11, %v1310_v17 }
 0x524   : > { %v1359_v22 = vsub.f32 1.0, %v1353_v58  ;;  %v1373_v14 = vsub.f32 0.0, %v1361_v5  ;;  %v1315_v10 = vmul.f32 %v3660_v54, %v1309_v39  ;;  %v2748_v7 = vpop.eup %2747 }
 0x525   : > { %v1326_v36 = vmul.f32 %v3646_v35, %v1320_v13  ;;  %v1360_v48 = vsub.f32 1.0, %v1354_v21  ;;  %v1322_v41 = vadd.f32 0.2548296, %v1316_v56  ;;  %v1722_v56 = vmul.f32 0.0, %v1714_v26 }
 0x526   : > { %v1371_v57 = vsub.f32 0.0, %v1359_v22  ;;  %v1379_v29 = vsel %vm1367_vm7, %v1361_v5, %v1373_v14  ;;  %v1321_v53 = vadd.f32 0.2548296, %v1315_v10  ;;  %v1386_v5 = vmul.f32 0.5, %v3614_v20 }
 0x527   : > { %v1356_v18 = vmul.f32 %v2744_v16, %v1326_v36  ;;  %v1372_v37 = vsub.f32 0.0, %v1360_v48  ;;  %v1328_v30 = vmul.f32 %v3653_v11, %v1322_v41  ;;  %v1391_v38 = vadd.f32 1.0, %v1379_v29 }
 0x528   : > { %v1377_v35 = vsel %vm1365_vm8, %v1359_v22, %v1371_v57  ;;  %v1327_v43 = vmul.f32 %v3660_v54, %v1321_v53  ;;  %v1385_v11 = vmul.f32 0.5, %v3580_v32  ;;  %v1388_v32 = vmul.f32 0.5, %v3624_v47  ;;  %v1580_v47 = vpop.permute.xlu0 %1579 }
 0x529   : > { %v1362_v42 = vsub.f32 1.0, %v1356_v18  ;;  %v1378_v63 = vsel %vm1366_vm9, %v1360_v48, %v1372_v37  ;;  %v1389_v6 = vadd.f32 1.0, %v1377_v35  ;;  %v1358_v51 = vmul.f32 %v2746_v45, %v1328_v30 }
 0x52a   : > { %v1390_v27 = vadd.f32 1.0, %v1378_v63  ;;  %v1357_v4 = vmul.f32 %v2748_v7, %v1327_v43  ;;  %v1397_v15 = vmul.f32 %v1391_v38, %v1385_v11  ;;  %v1387_v22 = vmul.f32 0.5, %v3626_v50 }
 0x52b   : > { %v1374_v24 = vsub.f32 0.0, %v1362_v42  ;;  %v1395_v61 = vmul.f32 %v1389_v6, %v1383_v46  ;;  %v1364_v13 = vsub.f32 1.0, %v1358_v51 }
 0x52c   : > { %v1396_v23 = vmul.f32 %v1390_v27, %v1384_v2  ;;  %v1363_v17 = vsub.f32 1.0, %v1357_v4  ;;  %v1584_v50 = vpop.permute.xlu0 %1583 }
 0x52d   : > { %v1380_v3 = vsel %vm1368_vm10, %v1362_v42, %v1374_v24  ;;  %1409 = vrot.lane.b32.xlu0 %v1395_v61, %s2959_s17  ;;  %v1376_v58 = vsub.f32 0.0, %v1364_v13 }
 0x52e   : > { %v1392_v12 = vadd.f32 1.0, %v1380_v3  ;;  %1411 = vrot.lane.b32.xlu1 %v1396_v23, %s2959_s17  ;;  %v1375_v21 = vsub.f32 0.0, %v1363_v17 }
 0x52f   : > { %v1382_v54 = vsel %vm1370_vm11, %v1364_v13, %v1376_v58 }
 0x530   : > { %v1398_v1 = vmul.f32 %v1392_v12, %v1386_v5  ;;  %v1394_v20 = vadd.f32 1.0, %v1382_v54  ;;  %v1381_v36 = vsel %vm1369_vm12, %v1363_v17, %v1375_v21  ;;  %v1618_v48 = vpop.permute.xlu0 %1617 }
 0x531   : > { %1413 = vrot.lane.b32.xlu0 %v1397_v15, %s2959_s17  ;;  %v1393_v14 = vadd.f32 1.0, %v1381_v36  ;;  %v1718_v55 = vpop.permute.xlu1 %1717  ;;  %v1626_v57 = vmul.f32 0.0, %v1618_v48 }
 0x532   : > { %1415 = vrot.lane.b32.xlu1 %v1398_v1, %s2959_s17  ;;  %v1400_v16 = vmul.f32 %v1394_v20, %v1388_v32  ;;  %v1725_v18 = vmul.f32 0.0, %v1718_v55 }
 0x533   : > { %v1399_v28 = vmul.f32 %v1393_v14, %v1387_v22 }
 0x534   : > { %v1762_v41 = vpop.permute.xlu0 %1761 }
 0x535   : > { %1417 = vrot.lane.b32.xlu0 %v1399_v28, %s2959_s17 }
 0x536   : > { %1419 = vrot.lane.b32.xlu1 %v1400_v16, %s2959_s17 }
 0x539   : > { %1457 = vperm.xlu0 %2694, %v3525_v52  }
 0x53a   : > { %1461 = vperm.xlu1 %2695, %v3530_v44  }
 0x53d   : > { %2697 = vset.pattern.permute.xlu0 %v2954_v49  ;;  %v1622_v49 = vpop.permute.xlu1 %1621 }
 0x53e   : > { %2696 = vset.pattern.permute.xlu1 %v2947_v31  ;;  %1565 = vperm.xlu0 %2697, %v3525_v52   ;;  %v1629_v39 = vmul.f32 0.0, %v1622_v49 }
 0x53f   : > { %1511 = vperm.xlu1 %2696, %v3525_v52  }
 0x541   : > { %v1766_v37 = vpop.permute.xlu1 %1765 }
 0x542   : > { %1569 = vperm.xlu0 %2697, %v3530_v44   ;;  %v1773_v58 = vmul.f32 0.0, %v1766_v37 }
 0x543   : > { %2698 = vset.pattern.permute.xlu1 %v2949_v33 }
 0x544   : > { %1699 = vperm.xlu1 %2698, %v3525_v52  }
 0x546   : > { %1736 = vrot.lane.b32.xlu0 %v1722_v56, %s2951_s14 }
 0x547   : > { %2701 = vset.pattern.permute.xlu0 %v2944_v0 }
 0x548   : > { %2699 = vset.pattern.permute.xlu1 %v2947_v31  ;;  %v1770_v31 = vmul.f32 0.0, %v1762_v41 }
 0x549   : > { %1515 = vperm.xlu1 %2699, %v3530_v44  }
 0x54a   : > { %1742 = vrot.lane.b32.xlu0 %v1725_v18, %s2951_s14 }
 0x54d   : > { %2700 = vset.pattern.permute.xlu1 %v2949_v33 }
 0x54e   : > { %1703 = vperm.xlu1 %2700, %v3530_v44   ;;  %1646 = vrot.lane.b32.xlu0 %v1629_v39, %s2952_s15 }
 0x552   : > { %1640 = vrot.lane.b32.xlu1 %v1626_v57, %s2952_s15 }
 0x553   : > { %2702 = vset.pattern.permute.xlu1 %v2944_v0 }
 0x556   : > { %1784 = vrot.lane.b32.xlu1 %v1770_v31, %s2952_s15 }
 0x59f   : > { %v1410_v42 = vpop.permute.xlu0 %1409 }
 0x5a0   : > { %v1412_v33 = vpop.permute.xlu1 %1411 }
 0x5a1   : > { %v3718_v35 = vsel %vm1421_vm13, %v1410_v42, %v1412_v33 }
 0x5a2   : > { %v1586_v29 = vmul.f32 %v1580_v47, %v3718_v35  ;;  %v1720_v63 = vmul.f32 %v1714_v26, %v3718_v35  ;;  %v1624_v27 = vmul.f32 %v1618_v48, %v3718_v35  ;;  %v1768_v61 = vmul.f32 %v1762_v41, %v3718_v35 }
 0x5a3   : > { %v1414_v10 = vpop.permute.xlu0 %1413 }
 0x5a4   : > { %1594 = vrot.lane.b32.xlu0 %v1586_v29, %s2951_s14  ;;  %v3723_v46 = vsel %vm1421_vm13, %v1412_v33, %v1414_v10  ;;  %v1416_v0 = vpop.permute.xlu1 %1415 }
 0x5a5   : > { %v1587_v30 = vmul.f32 %v1580_v47, %v3723_v46  ;;  %v1721_v6 = vmul.f32 %v1714_v26, %v3723_v46  ;;  %v1625_v45 = vmul.f32 %v1618_v48, %v3723_v46  ;;  %v1769_v53 = vmul.f32 %v1762_v41, %v3723_v46 }
 0x5a7   : > { %1596 = vrot.lane.b32.xlu1 %v1587_v30, %s2951_s14  ;;  %v1418_v24 = vpop.permute.xlu0 %1417 }
 0x5a8   : > { %1732 = vrot.lane.b32.xlu0 %v1720_v63, %s2951_s14  ;;  %v1420_v2 = vpop.permute.xlu1 %1419  ;;  %v3742_v38 = vsel %vm1421_vm13, %v1416_v0, %v1418_v24 }
 0x5a9   : > { %v3736_v51 = vsel %vm1421_vm13, %v1418_v24, %v1420_v2  ;;  %v1588_v23 = vmul.f32 %v1584_v50, %v3742_v38  ;;  %v1723_v43 = vmul.f32 %v1718_v55, %v3742_v38  ;;  %v1627_v11 = vmul.f32 %v1622_v49, %v3742_v38 }
 0x5aa   : > { %v1589_v3 = vmul.f32 %v1584_v50, %v3736_v51  ;;  %v1724_v7 = vmul.f32 %v1718_v55, %v3736_v51  ;;  %v1628_v5 = vmul.f32 %v1622_v49, %v3736_v51  ;;  %v1772_v12 = vmul.f32 %v1766_v37, %v3736_v51 }
 0x5ab   : > { %1734 = vrot.lane.b32.xlu1 %v1721_v6, %s2951_s14  ;;  %v1771_v4 = vmul.f32 %v1766_v37, %v3742_v38 }
 0x5ac   : > { %1638 = vrot.lane.b32.xlu0 %v1625_v45, %s2952_s15 }
 0x5af   : > { %1636 = vrot.lane.b32.xlu1 %v1624_v27, %s2952_s15 }
 0x5b0   : > { %1782 = vrot.lane.b32.xlu0 %v1769_v53, %s2952_s15 }
 0x5b3   : > { %1780 = vrot.lane.b32.xlu1 %v1768_v61, %s2952_s15 }
 0x5b4   : > { %1600 = vrot.lane.b32.xlu0 %v1589_v3, %s2951_s14 }
 0x5b7   : > { %1598 = vrot.lane.b32.xlu1 %v1588_v23, %s2951_s14 }
 0x5b8   : > { %1738 = vrot.lane.b32.xlu0 %v1723_v43, %s2951_s14  ;;  %v1458_v1 = vpop.permute.xlu0 %1457 }
 0x5b9   : > { %v1462_v13 = vpop.permute.xlu1 %1461  ;;  %v1465_v15 = vmul.f32 %v1458_v1, %v3718_v35  ;;  %v1464_v32 = vmul.f32 0.0, %v1458_v1 }
 0x5ba   : > { %v1467_v54 = vmul.f32 0.0, %v1462_v13  ;;  %v1469_v16 = vmul.f32 %v1462_v13, %v3736_v51  ;;  %v1468_v26 = vmul.f32 %v1462_v13, %v3742_v38 }
 0x5bb   : > { %1740 = vrot.lane.b32.xlu1 %v1724_v7, %s2951_s14 }
 0x5bc   : > { %1642 = vrot.lane.b32.xlu0 %v1627_v11, %s2952_s15 }
 0x5bd   : > { %v1566_v18 = vpop.permute.xlu0 %1565 }
 0x5be   : > { %v1512_v17 = vpop.permute.xlu1 %1511  ;;  %v1572_v0 = vmul.f32 0.0, %v1566_v18  ;;  %v1573_v45 = vmul.f32 %v1566_v18, %v3718_v35  ;;  %v1574_v53 = vmul.f32 %v1566_v18, %v3723_v46 }
 0x5bf   : > { %1644 = vrot.lane.b32.xlu1 %v1628_v5, %s2952_s15  ;;  %v1519_v21 = vmul.f32 %v1512_v17, %v3723_v46  ;;  %v1520_v14 = vmul.f32 0.0, %v1512_v17 }
 0x5c0   : > { %1788 = vrot.lane.b32.xlu0 %v1772_v12, %s2952_s15 }
 0x5c1   : > { %v1570_v49 = vpop.permute.xlu0 %1569 }
 0x5c3   : > { %1786 = vrot.lane.b32.xlu1 %v1771_v4, %s2952_s15  ;;  %v3767_v20 = vpop.permute.xlu1 %1699 }
 0x5c4   : > { %1442 = vperm.xlu0 %2701, %v3525_v52   ;;  %v1466_v52 = vmul.f32 %v1458_v1, %v3723_v46  ;;  %v1706_v61 = vmul.f32 0.0, %v3767_v20 }
 0x5c5   : > { %v1737_v57 = vpop.permute.xlu0 %1736 }
 0x5c7   : > { %1790 = vrot.lane.b32.xlu1 %v1773_v58, %s2952_s15 }
 0x5c8   : > { %1478 = vrot.lane.b32.xlu0 %v1465_v15, %s2951_s14  ;;  %v1516_v36 = vpop.permute.xlu1 %1515 }
 0x5c9   : > { %v1522_v22 = vmul.f32 %v1516_v36, %v3736_v51  ;;  %v1523_v28 = vmul.f32 0.0, %v1516_v36  ;;  %v1521_v47 = vmul.f32 %v1516_v36, %v3742_v38  ;;  %v3796_v41 = vpop.permute.xlu0 %1742 }
 0x5cb   : > { %1447 = vperm.xlu1 %2702, %v3530_v44   ;;  %v1518_v44 = vmul.f32 %v1512_v17, %v3718_v35 }
 0x5cc   : > { %1482 = vrot.lane.b32.xlu0 %v1467_v54, %s2951_s14 }
 0x5cd   : > { %v3794_v39 = vpop.permute.xlu1 %1703  ;;  %v1647_v37 = vpop.permute.xlu0 %1646 }
 0x5cf   : > { %1476 = vrot.lane.b32.xlu1 %v1464_v32, %s2951_s14  ;;  %v1575_v32 = vmul.f32 0.0, %v1570_v49 }
 0x5d0   : > { %1532 = vrot.lane.b32.xlu0 %v1519_v21, %s2952_s15 }
 0x5d1   : > { %v1641_v31 = vpop.permute.xlu1 %1640 }
 0x5d3   : > { %1480 = vrot.lane.b32.xlu1 %v1466_v52, %s2951_s14 }
 0x5d4   : > { %1486 = vrot.lane.b32.xlu0 %v1469_v16, %s2951_s14  ;;  %v1707_v16 = vmul.f32 %v3767_v20, %v3718_v35 }
 0x5d5   : > { %v1785_v42 = vpop.permute.xlu1 %1784 }
 0x5d7   : > { %1530 = vrot.lane.b32.xlu1 %v1518_v44, %s2952_s15 }
 0x5d8   : > { %1538 = vrot.lane.b32.xlu0 %v1522_v22, %s2952_s15 }
 0x5db   : > { %1534 = vrot.lane.b32.xlu1 %v1520_v14, %s2952_s15 }
 0x5df   : > { %1540 = vrot.lane.b32.xlu1 %v1523_v28, %s2952_s15  ;;  %v1576_v28 = vmul.f32 %v1570_v49, %v3742_v38 }
 0x5e3   : > { %1484 = vrot.lane.b32.xlu1 %v1468_v26, %s2951_s14  ;;  %v1577_v26 = vmul.f32 %v1570_v49, %v3736_v51  ;;  %v1710_v49 = vmul.f32 %v3794_v39, %v3742_v38 }
 0x5e7   : > { %v3785_v50 = vpop.f32.mrb[8].mxu1  ;;  %1536 = vrot.lane.b32.xlu1 %v1521_v47, %s2952_s15  ;;  %v1708_v47 = vmul.f32 %v3767_v20, %v3723_v46 }
 0x5e8   : > { %v3788_v55 = vpop.f32.mrb[9].mxu1 }
 0x5e9   : > { %v3790_v56 = vpop.f32.mrb[10].mxu1 }
 0x5ea   : > { %v3792_v48 = vpop.f32.mrb[11].mxu1 }
 0x616   : > { %v1595_v33 = vpop.permute.xlu0 %1594 }
 0x617   : > { %v1610_v2 = vadd.f32 %v1595_v33, %v1572_v0 }
 0x619   : > { %v1597_v29 = vpop.permute.xlu1 %1596 }
 0x61a   : > { %v1733_v10 = vpop.permute.xlu0 %1732  ;;  %v1602_v63 = vsel %vm822_vm1, %v1595_v33, %v1597_v29  ;;  %v1612_v5 = vadd.f32 %v1597_v29, %v1574_v53 }
 0x61b   : > { %v1611_v24 = vadd.f32 %v1602_v63, %v1573_v45  ;;  %v1754_v12 = vadd.f32 %v1733_v10, %v1706_v61 }
 0x61d   : > { %v1735_v30 = vpop.permute.xlu1 %1734 }
 0x61e   : > { %v1639_v6 = vpop.permute.xlu0 %1638  ;;  %v1744_v36 = vsel %vm822_vm1, %v1733_v10, %v1735_v30  ;;  %v1745_v44 = vsel %vm822_vm1, %v1735_v30, %v1737_v57 }
 0x61f   : > { %v1649_v7 = vsel %vm877_vm2, %v1639_v6, %v1641_v31  ;;  %v1709_v31 = vmul.f32 0.0, %v3794_v39  ;;  %v1755_v10 = vadd.f32 %v1744_v36, %v1707_v16  ;;  %v1756_v0 = vadd.f32 %v1745_v44, %v1708_v47 }
 0x620   : > { %v1660_v4 = vadd.f32 %v1649_v7, %v1612_v5 }
 0x621   : > { %v1637_v27 = vpop.permute.xlu1 %1636 }
 0x622   : > { %v1648_v3 = vsel %vm877_vm2, %v1637_v27, %v1639_v6  ;;  %v1658_v23 = vadd.f32 %v1637_v27, %v1610_v2  ;;  %v1783_v43 = vpop.permute.xlu0 %1782 }
 0x623   : > { %v1659_v11 = vadd.f32 %v1648_v3, %v1611_v24  ;;  %v1793_v33 = vsel %vm877_vm2, %v1783_v43, %v1785_v42 }
 0x624   : > { %1670 = vrot.lane.b32.xlu0 %v1658_v23, %s2957_s24  ;;  %v1804_v2 = vadd.f32 %v1793_v33, %v1756_v0 }
 0x625   : > { %v1781_v13 = vpop.permute.xlu1 %1780  ;;  %1672 = vrot.lane.b32.xlu1 %v1659_v11, %s2957_s24 }
 0x626   : > { %v1802_v1 = vadd.f32 %v1781_v13, %v1754_v12  ;;  %v1601_v58 = vpop.permute.xlu0 %1600  ;;  %v1792_v29 = vsel %vm877_vm2, %v1781_v13, %v1783_v43  ;;  %v1711_v43 = vmul.f32 %v3794_v39, %v3736_v51  ;;  %v1810_v11 = vmul.f32 %v1804_v2, %v3503_v9 }
 0x627   : > { %v1615_v57 = vadd.f32 %v1601_v58, %v1577_v26  ;;  %v1803_v42 = vadd.f32 %v1792_v29, %v1755_v10 }
 0x628   : > { %v1808_v15 = vmul.f32 %v1802_v1, %v3492_v8  ;;  %1674 = vrot.lane.b32.xlu0 %v1660_v4, %s2957_s24 }
 0x629   : > { %v1599_v17 = vpop.permute.xlu1 %1598  ;;  %v1809_v5 = vmul.f32 %v1803_v42, %v3510_v19 }
 0x62a   : > { %v1739_v54 = vpop.permute.xlu0 %1738  ;;  %1820 = vrot.lane.b32.xlu1 %v1808_v15, %s2958_s29  ;;  %v1613_v21 = vadd.f32 %v1599_v17, %v1575_v32  ;;  %v1603_v22 = vsel %vm822_vm1, %v1599_v17, %v1601_v58  ;;  %v677_v17 = vld [vmem:[%s4014_s3] sm:$0xff] }
 0x62b   : > { %v1614_v30 = vadd.f32 %v1603_v22, %v1576_v28  ;;  %v1757_v53 = vadd.f32 %v1739_v54, %v1709_v31 }
 0x62d   : > { %v1741_v52 = vpop.permute.xlu1 %1740 }
 0x62e   : > { %v1643_v14 = vpop.permute.xlu0 %1642  ;;  %v1746_v6 = vsel %vm822_vm1, %v1739_v54, %v1741_v52  ;;  %v1747_v7 = vsel %vm822_vm1, %v1741_v52, %v3796_v41 }
 0x62f   : > { %v1661_v18 = vadd.f32 %v1643_v14, %v1613_v21  ;;  %v1758_v61 = vadd.f32 %v1746_v6, %v1710_v49  ;;  %v1759_v4 = vadd.f32 %v1747_v7, %v1711_v43 }
 0x631   : > { %1676 = vrot.lane.b32.xlu0 %v1661_v18, %s2957_s24  ;;  %v1645_v63 = vpop.permute.xlu1 %1644 }
 0x632   : > { %v1650_v20 = vsel %vm877_vm2, %v1643_v14, %v1645_v63  ;;  %v1651_v45 = vsel %vm877_vm2, %v1645_v63, %v1647_v37  ;;  %v1789_v3 = vpop.permute.xlu0 %1788 }
 0x633   : > { %v1662_v24 = vadd.f32 %v1650_v20, %v1614_v30  ;;  %v1663_v27 = vadd.f32 %v1651_v45, %v1615_v57 }
 0x635   : > { %v1787_v23 = vpop.permute.xlu1 %1786  ;;  %1680 = vrot.lane.b32.xlu0 %v1663_v27, %s2957_s24  ;;  %1678 = vrot.lane.b32.xlu1 %v1662_v24, %s2957_s24 }
 0x636   : > { %v1794_v37 = vsel %vm877_vm2, %v1787_v23, %v1789_v3  ;;  %v1805_v12 = vadd.f32 %v1787_v23, %v1757_v53 }
 0x637   : > { %v1806_v13 = vadd.f32 %v1794_v37, %v1758_v61 }
 0x638   : > { %v1811_v39 = vmul.f32 %v1805_v12, %v3492_v8  ;;  %v678_v8 = vld [vmem:[%s4014_s3 + $0x8] sm:$0xff] }
 0x639   : > { %v1791_v1 = vpop.permute.xlu1 %1790  ;;  %1822 = vrot.lane.b32.xlu0 %v1809_v5, %s2958_s29  ;;  %1824 = vrot.lane.b32.xlu1 %v1810_v11, %s2958_s29  ;;  %v1812_v41 = vmul.f32 %v1806_v13, %v3510_v19 }
 0x63a   : > { %v1795_v58 = vsel %vm877_vm2, %v1789_v3, %v1791_v1 }
 0x63b   : > { %v1807_v15 = vadd.f32 %v1795_v58, %v1759_v4 }
 0x63d   : > { %1826 = vrot.lane.b32.xlu0 %v1811_v39, %s2958_s29  ;;  %1828 = vrot.lane.b32.xlu1 %v1812_v41, %s2958_s29  ;;  %v1813_v54 = vmul.f32 %v1807_v15, %v3503_v9 }
 0x641   : > { %1830 = vrot.lane.b32.xlu0 %v1813_v54, %s2958_s29  ;;  %681 = vperm.xlu1 %2702, %v677_v17  }
 0x643   : > { %v1443_v21 = vpop.permute.xlu0 %1442 }
 0x644   : > { %v1450_v29 = vmul.f32 0.0, %v1443_v21  ;;  %v1451_v30 = vmul.f32 %v1443_v21, %v3718_v35  ;;  %v1452_v61 = vmul.f32 %v1443_v21, %v3723_v46 }
 0x645   : > { %686 = vperm.xlu0 %2701, %v678_v8  }
 0x647   : > { %v1479_v16 = vpop.permute.xlu0 %1478 }
 0x64a   : > { %v1448_v19 = vpop.permute.xlu1 %1447 }
 0x64b   : > { %v1483_v44 = vpop.permute.xlu0 %1482  ;;  %v1453_v63 = vmul.f32 0.0, %v1448_v19  ;;  %v1454_v43 = vmul.f32 %v1448_v19, %v3742_v38  ;;  %v1455_v1 = vmul.f32 %v1448_v19, %v3736_v51 }
 0x64e   : > { %v1477_v32 = vpop.permute.xlu1 %1476 }
 0x64f   : > { %v1533_v14 = vpop.permute.xlu0 %1532  ;;  %v1488_v0 = vsel %vm822_vm1, %v1477_v32, %v1479_v16 }
 0x650   : > { %v1498_v20 = vadd.f32 %v1488_v0, %v1450_v29 }
 0x652   : > { %v1481_v52 = vpop.permute.xlu1 %1480 }
 0x653   : > { %v1487_v26 = vpop.permute.xlu0 %1486  ;;  %v1489_v57 = vsel %vm822_vm1, %v1479_v16, %v1481_v52  ;;  %v1500_v4 = vadd.f32 %v1481_v52, %v1452_v61 }
 0x654   : > { %v1499_v45 = vadd.f32 %v1489_v57, %v1451_v30  ;;  %v1503_v51 = vadd.f32 %v1487_v26, %v1455_v1 }
 0x656   : > { %v1531_v36 = vpop.permute.xlu1 %1530 }
 0x657   : > { %v1539_v47 = vpop.permute.xlu0 %1538  ;;  %v1542_v49 = vsel %vm877_vm2, %v1531_v36, %v1533_v14  ;;  %v1552_v24 = vadd.f32 %v1531_v36, %v1498_v20 }
 0x658   : > { %v1553_v27 = vadd.f32 %v1542_v49, %v1499_v45 }
 0x659   : > { %v1558_v11 = vmul.f32 %v1552_v24, %v3555_v59 }
 0x65a   : > { %v1535_v22 = vpop.permute.xlu1 %1534  ;;  %v1559_v13 = vmul.f32 %v1553_v27, %v3570_v25 }
 0x65b   : > { %v1543_v5 = vsel %vm877_vm2, %v1533_v14, %v1535_v22 }
 0x65c   : > { %v1554_v17 = vadd.f32 %v1543_v5, %v1500_v4  ;;  %v2960_v5 = vmov 1.0|1.0  }
 0x65e   : > { %v1541_v28 = vpop.permute.xlu1 %1540 }
 0x662   : > { %v1485_v9 = vpop.permute.xlu1 %1484 }
 0x663   : > { %v1490_v6 = vsel %vm822_vm1, %v1483_v44, %v1485_v9  ;;  %v1491_v35 = vsel %vm822_vm1, %v1485_v9, %v1487_v26  ;;  %v1545_v44 = vsel %vm877_vm2, %v1539_v47, %v1541_v28 }
 0x664   : > { %v1501_v53 = vadd.f32 %v1490_v6, %v1453_v63  ;;  %v1502_v58 = vadd.f32 %v1491_v35, %v1454_v43  ;;  %v1882_v43 = vand.u32 127, %v895_v60 }
 0x666   : > { %v1537_v18 = vpop.permute.xlu1 %1536  ;;  %vm1883_vm14 = vcmp.eq.s32.totalorder %v3389_v62, %v1882_v43 }
 0x667   : > { %v1555_v12 = vadd.f32 %v1537_v18, %v1501_v53  ;;  %v1544_v46 = vsel %vm877_vm2, %v1537_v18, %v1539_v47 }
 0x668   : > { %v1556_v21 = vadd.f32 %v1544_v46, %v1502_v58 }
 0x669   : > { %v1561_v16 = vmul.f32 %v1555_v12, %v3555_v59 }
 0x66a   : > { %v1562_v59 = vmul.f32 %v1556_v21, %v3570_v25 }
 0x696   : > { %v1671_v31 = vpop.permute.xlu0 %1670 }
 0x697   : > { %v1673_v33 = vpop.permute.xlu1 %1672 }
 0x698   : > { %v1682_v7 = vsel %vm1048_vm5, %v1671_v31, %v1673_v33  ;;  %v1557_v31 = vadd.f32 %v1545_v44, %v1503_v51 }
 0x699   : > { %v1692_v38 = vadd.f32 %v1682_v7, %v1558_v11 }
 0x69a   : > { %v1675_v10 = vpop.permute.xlu0 %1674  ;;  %v1563_v57 = vmul.f32 %v1557_v31, %v3557_v40 }
 0x69b   : > { %v1683_v37 = vsel %vm1048_vm5, %v1673_v33, %v1675_v10  ;;  %v1560_v33 = vmul.f32 %v1554_v17, %v3557_v40 }
 0x69c   : > { %v1821_v2 = vpop.permute.xlu1 %1820  ;;  %v1693_v39 = vadd.f32 %v1683_v37, %v1559_v13 }
 0x69d   : > { %v1694_v0 = vadd.f32 %v1675_v10, %v1560_v33 }
 0x6a3   : > { %v1677_v42 = vpop.permute.xlu0 %1676 }
 0x6a7   : > { %v1679_v3 = vpop.permute.xlu1 %1678  ;;  %v1681_v23 = vpop.permute.xlu0 %1680 }
 0x6a8   : > { %v1684_v54 = vsel %vm1048_vm5, %v1677_v42, %v1679_v3  ;;  %v1685_v9 = vsel %vm1048_vm5, %v1679_v3, %v1681_v23  ;;  %v1697_v49 = vadd.f32 %v1681_v23, %v1563_v57  ;;  %v1880_v23 = vadd.s32 8, %v3389_v62 }
 0x6a9   : > { %v1695_v19 = vadd.f32 %v1684_v54, %v1561_v16  ;;  %v1696_v28 = vadd.f32 %v1685_v9, %v1562_v59 }
 0x6aa   : > { %vm1884_vm15 = vcmp.eq.s32.totalorder %v1880_v23, %v1882_v43 }
 0x6ab   : > { %v1825_v41 = vpop.permute.xlu1 %1824  ;;  %v1823_v15 = vpop.permute.xlu0 %1822  ;;  %vm2564_vm1 = vmpackc.low %vm1884_vm15, %vm1883_vm14 }
 0x6ac   : > { %v1832_v8 = vsel %vm1228_vm6, %v1821_v2, %v1823_v15  ;;  %v1833_v32 = vsel %vm1228_vm6, %v1823_v15, %v1825_v41  ;;  %v1844_v30 = vadd.f32 %v1825_v41, %v1694_v0  ;;  %2565 = vmatprep.subr.msk.bf16.mxu0 %vm2564_vm1, %v2960_v5  ;;  %2568 = vmatprep.subr.msk.bf16.mxu1 %vm2564_vm1, %v2960_v5 }
 0x6ad   : > { %v1842_v52 = vadd.f32 %v1832_v8, %v1692_v38  ;;  %v1843_v36 = vadd.f32 %v1833_v32, %v1693_v39  ;;  %2567 = vmatpush3.bf16.msk.msra.mxu0 %vm2564_vm1, %v2960_v5  ;;  %2569 = vmatpush3.bf16.msk.msra.mxu1 %vm2564_vm1, %v2960_v5 }
 0x6af   : > { %v1829_v22 = vpop.permute.xlu1 %1828  ;;  %1856 = vrot.lane.b32.xlu0 %v1843_v36, %s2959_s17  ;;  %1854 = vrot.lane.b32.xlu1 %v1842_v52, %s2959_s17  ;;  %v1827_v14 = vpop.permute.xlu0 %1826 }
 0x6b0   : > { %v1834_v18 = vsel %vm1228_vm6, %v1827_v14, %v1829_v22 }
 0x6b1   : > { %v1845_v29 = vadd.f32 %v1834_v18, %v1695_v19 }
 0x6b3   : > { %1860 = vrot.lane.b32.xlu1 %v1845_v29, %s2959_s17  ;;  %v1831_v26 = vpop.permute.xlu0 %1830 }
 0x6b4   : > { %v1835_v47 = vsel %vm1228_vm6, %v1829_v22, %v1831_v26  ;;  %v1847_v6 = vadd.f32 %v1831_v26, %v1697_v49 }
 0x6b5   : > { %v1846_v63 = vadd.f32 %v1835_v47, %v1696_v28 }
 0x6b7   : > { %1858 = vrot.lane.b32.xlu1 %v1844_v30, %s2959_s17  ;;  %1862 = vrot.lane.b32.xlu0 %v1846_v63, %s2959_s17 }
 0x6bb   : > { %1864 = vrot.lane.b32.xlu0 %v1847_v6, %s2959_s17 }
 0x6c0   : > { %v682_v25 = vpop.permute.xlu1 %681 }
 0x6c1   : > { %v749_v20 = vadd.f32 %v3785_v50, %v682_v25  ;;  %v751_v27 = vadd.f32 %v3788_v55, %v682_v25 }
 0x6c4   : > { %v687_v10 = vpop.permute.xlu0 %686 }
 0x6c5   : > { %v753_v53 = vadd.f32 %v3790_v56, %v687_v10  ;;  %v755_v55 = vadd.f32 %v3792_v48, %v687_v10 }
 0x721   : > { %v1855_v45 = vpop.permute.xlu1 %1854  ;;  %v1857_v2 = vpop.permute.xlu0 %1856 }
 0x722   : > { %v1866_v42 = vsel %vm1421_vm13, %v1855_v45, %v1857_v2 }
 0x723   : > { %v1874_v24 = vadd.f32 %v1866_v42, %v749_v20 }
 0x725   : > { %v1861_v40 = vpop.permute.xlu1 %1860  ;;  %1889 = vxpose.xlu1.b32.start [1/2] (short) %v1874_v24, 128 }
 0x729   : > { %v1859_v61 = vpop.permute.xlu1 %1858  ;;  %v1863_v3 = vpop.permute.xlu0 %1862 }
 0x72a   : > { %v1867_v35 = vsel %vm1421_vm13, %v1857_v2, %v1859_v61  ;;  %v1868_v50 = vsel %vm1421_vm13, %v1861_v40, %v1863_v3 }
 0x72b   : > { %v1875_v7 = vadd.f32 %v1867_v35, %v751_v27  ;;  %v1876_v37 = vadd.f32 %v1868_v50, %v753_v53 }
 0x72d   : > { %1921 = vxpose.xlu0.b32.start [1/2] (short) %v1875_v7, 128  ;;  %1890 = vxpose.xlu1.b32.end [2/2] (short) %v1876_v37, 128  ;;  %v1865_v56 = vpop.permute.xlu0 %1864 }
 0x72e   : > { %v1869_v11 = vsel %vm1421_vm13, %v1863_v3, %v1865_v56 }
 0x72f   : > { %v1877_v60 = vadd.f32 %v1869_v11, %v755_v55 }
 0x731   : > { %1922 = vxpose.xlu0.b32.end [2/2] (short) %v1877_v60, 128 }
 0x75a   : > { %2703 = vset.pattern.permute.xlu0 %v2950_v34 }
 0x7a9   : > { %v1905_v12 = vpop.trf.xlu1 }
 0x7aa   : > { %2516 = vmatprep.mubr.msk.f32.mxu0 %vm448_vm0, %v1905_v12 }
 0x7ad   : > { %v1906_v62 = vpop.trf.xlu1  ;;  %v1937_v13 = vpop.trf.xlu0 }
 0x7ae   : > { %2517 = vmatmul.mubr.msk.f32.vlgmr.msra.gmra.mrb[12].mxu0 %vm448_vm0, %v1906_v62 }
 0x7b1   : > { %v1907_v48 = vpop.trf.xlu1  ;;  %v1938_v4 = vpop.trf.xlu0 }
 0x7b2   : > { %2519 = vmatprep.mubr.msk.f32.mxu0 %vm448_vm0, %v1907_v48 }
 0x7b5   : > { %v1908_v46 = vpop.trf.xlu1  ;;  %v1939_v1 = vpop.trf.xlu0 }
 0x7b6   : > { %2520 = vmatmul.mubr.msk.f32.gmra.mrb[14].mxu0 %vm448_vm0, %v1908_v46  ;;  %2543 = vmatprep.mubr.msk.f32.mxu1 %vm448_vm0, %v1939_v1 }
 0x7b9   : > { %v1909_v58 = vpop.trf.xlu1  ;;  %v1940_v38 = vpop.trf.xlu0 }
 0x7ba   : > { %2522 = vmatprep.mubr.msk.f32.mxu0 %vm448_vm0, %v1909_v58  ;;  %2544 = vmatmul.mubr.msk.f32.vlgmr.msra.gmra.mrb[12].mxu1 %vm448_vm0, %v1940_v38 }
 0x7bd   : > { %v1910_v34 = vpop.trf.xlu1  ;;  %v1941_v39 = vpop.trf.xlu0 }
 0x7be   : > { %2523 = vmatmul.mubr.msk.f32.gmra.mrb[16].mxu0 %vm448_vm0, %v1910_v34  ;;  %2546 = vmatprep.mubr.msk.f32.mxu1 %vm448_vm0, %v1941_v39 }
 0x7c1   : > { %v1911_v41 = vpop.trf.xlu1  ;;  %v1942_v15 = vpop.trf.xlu0 }
 0x7c2   : > { %2525 = vmatprep.mubr.msk.f32.mxu0 %vm448_vm0, %v1911_v41  ;;  %2547 = vmatmul.mubr.msk.f32.gmra.mrb[14].mxu1 %vm448_vm0, %v1942_v15 }
 0x7c5   : > { %v1912_v17 = vpop.trf.xlu1  ;;  %v1943_v54 = vpop.trf.xlu0 }
 0x7c6   : > { %2526 = vmatmul.mubr.msk.f32.gmra.mrb[18].mxu0 %vm448_vm0, %v1912_v17  ;;  %2549 = vmatprep.mubr.msk.f32.mxu1 %vm448_vm0, %v1943_v54 }
 0x7c9   : > { %v1913_v8 = vpop.trf.xlu1  ;;  %v1944_v32 = vpop.trf.xlu0 }
 0x7ca   : > { %2528 = vmatprep.mubr.msk.f32.mxu0 %vm448_vm0, %v1913_v8  ;;  %2550 = vmatmul.mubr.msk.f32.gmra.mrb[16].mxu1 %vm448_vm0, %v1944_v32 }
 0x7cd   : > { %v1914_v21 = vpop.trf.xlu1  ;;  %v1945_v16 = vpop.trf.xlu0 }
 0x7ce   : > { %2529 = vmatmul.mubr.msk.f32.gmra.mrb[20].mxu0 %vm448_vm0, %v1914_v21  ;;  %2552 = vmatprep.mubr.msk.f32.mxu1 %vm448_vm0, %v1945_v16 }
 0x7d1   : > { %v1915_v52 = vpop.trf.xlu1  ;;  %v1946_v36 = vpop.trf.xlu0 }
 0x7d2   : > { %2531 = vmatprep.mubr.msk.f32.mxu0 %vm448_vm0, %v1915_v52  ;;  %2553 = vmatmul.mubr.msk.f32.gmra.mrb[18].mxu1 %vm448_vm0, %v1946_v36 }
 0x7d5   : > { %v1916_v44 = vpop.trf.xlu1  ;;  %v1947_v51 = vpop.trf.xlu0 }
 0x7d6   : > { %2532 = vmatmul.mubr.msk.f32.gmra.mrb[22].mxu0 %vm448_vm0, %v1916_v44  ;;  %2555 = vmatprep.mubr.msk.f32.mxu1 %vm448_vm0, %v1947_v51 }
 0x7d9   : > { %v1917_v19 = vpop.trf.xlu1  ;;  %v1948_v22 = vpop.trf.xlu0 }
 0x7da   : > { %2534 = vmatprep.mubr.msk.f32.mxu0 %vm448_vm0, %v1917_v19  ;;  %2556 = vmatmul.mubr.msk.f32.gmra.mrb[20].mxu1 %vm448_vm0, %v1948_v22 }
 0x7dd   : > { %v1918_v14 = vpop.trf.xlu1  ;;  %v1949_v9 = vpop.trf.xlu0 }
 0x7de   : > { %2535 = vmatmul.mubr.msk.f32.gmra.mrb[24].mxu0 %vm448_vm0, %v1918_v14  ;;  %2558 = vmatprep.mubr.msk.f32.mxu1 %vm448_vm0, %v1949_v9 }
 0x7e1   : > { %v1919_v18 = vpop.trf.xlu1  ;;  %v1950_v31 = vpop.trf.xlu0 }
 0x7e2   : > { %2537 = vmatprep.mubr.msk.f32.mxu0 %vm448_vm0, %v1919_v18  ;;  %2559 = vmatmul.mubr.msk.f32.gmra.mrb[22].mxu1 %vm448_vm0, %v1950_v31 }
 0x7e5   : > { %v1920_v33 = vpop.trf.xlu1  ;;  %v1951_v59 = vpop.trf.xlu0 }
 0x7e6   : > { %2538 = vmatmul.mubr.msk.f32.gmra.mrb[26].mxu0 %vm448_vm0, %v1920_v33  ;;  %2561 = vmatprep.mubr.msk.f32.mxu1 %vm448_vm0, %v1951_v59 }
 0x7e7   : > { %2540 = vmatprep.mubr.msk.f32.mxu0 %vm448_vm0, %v1937_v13 }
 0x7e9   : > { %v1952_v29 = vpop.trf.xlu0 }
 0x7ea   : > { %2541 = vmatmul.mubr.msk.f32.gmra.mrb[28].mxu0 %vm448_vm0, %v1938_v4  ;;  %2562 = vmatmul.mubr.msk.f32.gmra.mrb[24].mxu1 %vm448_vm0, %v1952_v29 }
 0x881   : > { %v2518_v0 = vpop.f32.mrb[12].mxu0 }
 0x882   : > { %2275 = vst.msk [vmem:[%s3932_s12 + $0x8] sm:$0xff] %vm448_vm0, %v2518_v0  ;;  %v2115_v28 = vpop.f32.mrb[13].mxu0 }
 0x883   : > { %2274 = vst.msk [vmem:[%s3932_s12] sm:$0xff] %vm448_vm0, %v2115_v28 }
 0x889   : > { %v2521_v26 = vpop.f32.mrb[14].mxu0 }
 0x88a   : > { %2277 = vst.msk [vmem:[%s3932_s12 + $0x18] sm:$0xff] %vm448_vm0, %v2521_v26  ;;  %v2125_v47 = vpop.f32.mrb[15].mxu0 }
 0x88b   : > { %2276 = vst.msk [vmem:[%s3932_s12 + $0x10] sm:$0xff] %vm448_vm0, %v2125_v47 }
 0x88d   : > { %v2545_v57 = vpop.f32.mrb[12].mxu1 }
 0x88e   : > { %2293 = vst.msk [vmem:[%s3932_s12 + $0x98] sm:$0xff] %vm448_vm0, %v2545_v57  ;;  %v2205_v30 = vpop.f32.mrb[13].mxu1 }
 0x88f   : > { %2292 = vst.msk [vmem:[%s3932_s12 + $0x90] sm:$0xff] %vm448_vm0, %v2205_v30 }
 0x891   : > { %v2524_v63 = vpop.f32.mrb[16].mxu0 }
 0x892   : > { %2279 = vst.msk [vmem:[%s3932_s12 + $0x28] sm:$0xff] %vm448_vm0, %v2524_v63  ;;  %v2135_v49 = vpop.f32.mrb[17].mxu0 }
 0x893   : > { %2278 = vst.msk [vmem:[%s3932_s12 + $0x20] sm:$0xff] %vm448_vm0, %v2135_v49 }
 0x895   : > { %v2548_v6 = vpop.f32.mrb[14].mxu1 }
 0x896   : > { %2295 = vst.msk [vmem:[%s3932_s12 + $0xa8] sm:$0xff] %vm448_vm0, %v2548_v6  ;;  %v2215_v25 = vpop.f32.mrb[15].mxu1 }
 0x897   : > { %2294 = vst.msk [vmem:[%s3932_s12 + $0xa0] sm:$0xff] %vm448_vm0, %v2215_v25 }
 0x899   : > { %v2527_v10 = vpop.f32.mrb[18].mxu0 }
 0x89a   : > { %2281 = vst.msk [vmem:[%s3932_s12 + $0x38] sm:$0xff] %vm448_vm0, %v2527_v10  ;;  %v2145_v20 = vpop.f32.mrb[19].mxu0 }
 0x89b   : > { %2280 = vst.msk [vmem:[%s3932_s12 + $0x30] sm:$0xff] %vm448_vm0, %v2145_v20 }
 0x89d   : > { %v2551_v45 = vpop.f32.mrb[16].mxu1 }
 0x89e   : > { %2297 = vst.msk [vmem:[%s3932_s12 + $0xb8] sm:$0xff] %vm448_vm0, %v2551_v45  ;;  %v2225_v2 = vpop.f32.mrb[17].mxu1 }
 0x89f   : > { %2296 = vst.msk [vmem:[%s3932_s12 + $0xb0] sm:$0xff] %vm448_vm0, %v2225_v2 }
 0x8a1   : > { %v2530_v42 = vpop.f32.mrb[20].mxu0 }
 0x8a2   : > { %2283 = vst.msk [vmem:[%s3932_s12 + $0x48] sm:$0xff] %vm448_vm0, %v2530_v42  ;;  %v2155_v24 = vpop.f32.mrb[21].mxu0 }
 0x8a3   : > { %2282 = vst.msk [vmem:[%s3932_s12 + $0x40] sm:$0xff] %vm448_vm0, %v2155_v24 }
 0x8a5   : > { %v2554_v40 = vpop.f32.mrb[18].mxu1 }
 0x8a6   : > { %2299 = vst.msk [vmem:[%s3932_s12 + $0xc8] sm:$0xff] %vm448_vm0, %v2554_v40  ;;  %v2235_v27 = vpop.f32.mrb[19].mxu1 }
 0x8a7   : > { %2298 = vst.msk [vmem:[%s3932_s12 + $0xc0] sm:$0xff] %vm448_vm0, %v2235_v27 }
 0x8a9   : > { %v2533_v53 = vpop.f32.mrb[22].mxu0 }
 0x8aa   : > { %2285 = vst.msk [vmem:[%s3932_s12 + $0x58] sm:$0xff] %vm448_vm0, %v2533_v53  ;;  %v2165_v61 = vpop.f32.mrb[23].mxu0 }
 0x8ab   : > { %2284 = vst.msk [vmem:[%s3932_s12 + $0x50] sm:$0xff] %vm448_vm0, %v2165_v61 }
 0x8ad   : > { %v2557_v3 = vpop.f32.mrb[20].mxu1 }
 0x8ae   : > { %2301 = vst.msk [vmem:[%s3932_s12 + $0xd8] sm:$0xff] %vm448_vm0, %v2557_v3  ;;  %v2245_v23 = vpop.f32.mrb[21].mxu1 }
 0x8af   : > { %2300 = vst.msk [vmem:[%s3932_s12 + $0xd0] sm:$0xff] %vm448_vm0, %v2245_v23 }
 0x8b1   : > { %v2536_v43 = vpop.f32.mrb[24].mxu0 }
 0x8b2   : > { %2287 = vst.msk [vmem:[%s3932_s12 + $0x68] sm:$0xff] %vm448_vm0, %v2536_v43  ;;  %v2175_v35 = vpop.f32.mrb[25].mxu0 }
 0x8b3   : > { %2286 = vst.msk [vmem:[%s3932_s12 + $0x60] sm:$0xff] %vm448_vm0, %v2175_v35 }
 0x8b5   : > { %v2560_v50 = vpop.f32.mrb[22].mxu1 }
 0x8b6   : > { %2303 = vst.msk [vmem:[%s3932_s12 + $0xe8] sm:$0xff] %vm448_vm0, %v2560_v50  ;;  %v2255_v7 = vpop.f32.mrb[23].mxu1 }
 0x8b7   : > { %2302 = vst.msk [vmem:[%s3932_s12 + $0xe0] sm:$0xff] %vm448_vm0, %v2255_v7 }
 0x8b9   : > { %v2539_v37 = vpop.f32.mrb[26].mxu0 }
 0x8ba   : > { %2289 = vst.msk [vmem:[%s3932_s12 + $0x78] sm:$0xff] %vm448_vm0, %v2539_v37  ;;  %v2185_v55 = vpop.f32.mrb[27].mxu0 }
 0x8bb   : > { %2288 = vst.msk [vmem:[%s3932_s12 + $0x70] sm:$0xff] %vm448_vm0, %v2185_v55 }
 0x8bd   : > { %v2542_v56 = vpop.f32.mrb[28].mxu0  ;;  %v2563_v11 = vpop.f32.mrb[24].mxu1 }
 0x8be   : > { %2291 = vst.msk [vmem:[%s3932_s12 + $0x88] sm:$0xff] %vm448_vm0, %v2542_v56  ;;  %2305 = vst.msk [vmem:[%s3932_s12 + $0xf8] sm:$0xff] %vm448_vm0, %v2563_v11  ;;  %v2195_v5 = vpop.f32.mrb[29].mxu0  ;;  %v2265_v60 = vpop.f32.mrb[25].mxu1 }
 0x8bf   : > { %2290 = vst.msk [vmem:[%s3932_s12 + $0x80] sm:$0xff] %vm448_vm0, %v2195_v5  ;;  %2304 = vst.msk [vmem:[%s3932_s12 + $0xf0] sm:$0xff] %vm448_vm0, %v2265_v60 }
 0x8c0 PF: > { %s4044_s13 = smov %s3168_s30  ;;  %p21_p4 = scmp.ge.s32.totalorder %s3159_s26, 4  }
 0x8c1   : > { %s4045_s30 = smov %s2925_s10  ;;  %s4046_s10 = smov %s2929_s11 }
 0x8c2   : > { %s4047_s11 = smov %s4044_s13  ;;  %s4048_s12 = smov %s3159_s26 }
 0x8c3   :  { %23 = sbr.rel (!%p21_p4) target bundleno = 7 (0x7), region = 112 }
 0x8ca   :  { %2327 = vsyncpa [#allocation4], 1 }
 0x8cb   :  { %2329 = vsyncpa [#allocation4 + $0x1], 1 }
 0x8cc   :  { %2330 = vsyncpa [#allocation6], 1 }
 0x8cd   :  { %2331 = vsyncpa [#allocation9], 1 }

</bundles_post_ra>
